<compile_context>
chip_gen: v7x
topology: tpu7x:2x2x1
jax: 0.10.0
libtpu: 0.0.40
codegen_flags: <defaults>
</compile_context>

<pallas_src>
import functools

import jax
import jax.numpy as jnp
from jax.experimental import pallas as pl
from jax.experimental.pallas import tpu as pltpu

_ON_TPU = jax.default_backend() == "tpu"


# --------------------------- fused forward kernel ---------------------------
def fused_topic_backward_kernel(
    x_ref, wih_ref, whh_ref, blstm_ref,
    w1_ref, b1_ref, w2_ref, b2_ref, w3_ref, b3_ref,
    u_ref, z_ref, logits_ref, *, tau, use_approx_recip):
    B, L, V = x_ref.shape
    D = whh_ref.shape[0]
    K = w3_ref.shape[1]

    # ---- LSTM: hoisted input projection (one MXU pass for all timesteps) ----
    x2d = x_ref[...].reshape(B * L, V)                       # (B*L, V)
    xp = jnp.dot(x2d, wih_ref[...],
                 preferred_element_type=jnp.float32) + blstm_ref[...]   # (B*L, 4D)
    xp = xp.reshape(B, L, 4 * D)                             # gate order: i, f, g, o

    whh = whh_ref[...]                                       # (D, 4D), loaded once
    h = jnp.zeros((B, D), jnp.float32)
    c = jnp.zeros((B, D), jnp.float32)
    hs = []
    # Static unroll: only h @ W_hh + gate math sits on the serial recurrence path.
    for t in range(L):
        gates = xp[:, t, :] + jnp.dot(h, whh, preferred_element_type=jnp.float32)
        i = jax.nn.sigmoid(gates[:, 0 * D:1 * D])
        f = jax.nn.sigmoid(gates[:, 1 * D:2 * D])
        g = jnp.tanh(gates[:, 2 * D:3 * D])
        o = jax.nn.sigmoid(gates[:, 3 * D:4 * D])
        c = f * c + i * g
        h = o * jnp.tanh(c)
        hs.append(h)
    # torch.flatten(h, 1, 2): column block t holds h_t  -> (B, L*D)
    h_flat = jnp.concatenate(hs, axis=-1)

    # ---- InferenceNetwork: L*D -> H -> D -> K with ReLU ----
    h1 = jnp.maximum(
        jnp.dot(h_flat, w1_ref[...], preferred_element_type=jnp.float32) + b1_ref[...], 0.0)
    h2 = jnp.maximum(
        jnp.dot(h1, w2_ref[...], preferred_element_type=jnp.float32) + b2_ref[...], 0.0)
    logits = jnp.dot(h2, w3_ref[...], preferred_element_type=jnp.float32) + b3_ref[...]  # (B, K)

    # logits.unsqueeze(1) * ones((B, L, K))
    logits_b = jnp.broadcast_to(logits[:, None, :], (B, L, K))
    logits_ref[...] = logits_b

    # ---- Sample_Categorical: Gumbel-Softmax with temperature tau ----
    u = u_ref[...]                                           # uniform in [1e-6, 1-1e-6)
    gum = -jnp.log(-jnp.log(u))                              # Gumbel(0, 1)
    y = (logits_b + gum) * (1.0 / tau)
    y = y - jnp.max(y, axis=-1, keepdims=True)
    e = jnp.exp(y)
    denom = jnp.sum(e, axis=-1, keepdims=True)
    if use_approx_recip:
        inv = pl.reciprocal(denom, approx=True)              # EUP slot on real TPU
    else:
        inv = 1.0 / denom                                    # portable (interpret/CPU)
    z_ref[...] = e * inv


# ------------------------------ wrapper --------------------------------------
def topic_backward(params, x_blv, key, tau):
    """x_blv: (B, L, V) float32 (batch_first, exactly as the PyTorch module)."""
    B, L, V = x_blv.shape
    D = params["w_hh_t"].shape[0]
    H = params["w1"].shape[1]
    K = params["w3"].shape[1]

    # Gumbel noise for the sampler (hardware PRNG is not portable to interpret mode).
    u = jax.random.uniform(key, (B, L, K), jnp.float32,
                           minval=1e-6, maxval=1.0 - 1e-6)

    flops = (2 * B * L * V * 4 * D                     # hoisted x @ W_ih
             + L * 2 * B * D * 4 * D                   # recurrence h @ W_hh
             + 2 * B * (L * D * H + H * D + D * K)     # MLP
             + 10 * B * L * K)                         # sampler elementwise
    transcendentals = 5 * L * B * D + 3 * B * L * K
    bytes_accessed = 4 * (B * L * V + V * 4 * D + D * 4 * D + 4 * D
                          + L * D * H + H + H * D + D + D * K + K
                          + B * L * K                  # noise in
                          + 2 * B * L * K)             # z, logits out

    vmem = lambda: pl.BlockSpec(memory_space=pltpu.MemorySpace.VMEM)
    z, logits = pl.pallas_call(
        functools.partial(fused_topic_backward_kernel,
                          tau=float(tau), use_approx_recip=_ON_TPU),
        out_shape=(jax.ShapeDtypeStruct((B, L, K), jnp.float32),
                   jax.ShapeDtypeStruct((B, L, K), jnp.float32)),
        in_specs=[vmem() for _ in range(11)],
        out_specs=(vmem(), vmem()),
        cost_estimate=pl.CostEstimate(flops=flops,
                                      transcendentals=transcendentals,
                                      bytes_accessed=bytes_accessed),
    )(x_blv, params["w_ih_t"], params["w_hh_t"], params["b_lstm"],
      params["w1"], params["b1"], params["w2"], params["b2"],
      params["w3"], params["b3"], u)
    return z, logits


def init_params(key, L, V, K, H, D):
    ks = jax.random.split(key, 10)

    def uni(k, shape, fan_in):
        bound = 1.0 / jnp.sqrt(jnp.float32(fan_in))
        return jax.random.uniform(k, shape, jnp.float32, -bound, bound)

    # LSTM weights stored pre-transposed ((in, 4D)), gate order (i, f, g, o);
    # bias_ih + bias_hh folded into a single bias row.
    return {
        "w_ih_t": uni(ks[0], (V, 4 * D), D),
        "w_hh_t": uni(ks[1], (D, 4 * D), D),
        "b_lstm": uni(ks[2], (1, 4 * D), D) + uni(ks[3], (1, 4 * D), D),
        "w1": uni(ks[4], (L * D, H), L * D), "b1": uni(ks[5], (1, H), L * D),
        "w2": uni(ks[6], (H, D), H),         "b2": uni(ks[7], (1, D), H),
        "w3": uni(ks[8], (D, K), D),         "b3": uni(ks[9], (1, K), D),
    }


if __name__ == "__main__":
    # Small shapes consistent with the module: x is (B, L, V).
    B, L, V, K, H, D = 2, 8, 32, 8, 32, 16
    tau = 0.5

    key = jax.random.PRNGKey(0)
    kp, kx, ku = jax.random.split(key, 3)
    params = init_params(kp, L, V, K, H, D)
    x = jax.random.normal(kx, (B, L, V), jnp.float32)

    z, logits = topic_backward(params, x, ku, tau)
    jax.block_until_ready((z, logits))

    assert z.shape == (B, L, K) and logits.shape == (B, L, K)
    assert bool(jnp.all(jnp.isfinite(z))) and bool(jnp.all(jnp.isfinite(logits)))
    # Gumbel-softmax rows sum to 1 (loose tolerance: approx reciprocal on TPU).
    assert bool(jnp.allclose(jnp.sum(z, axis=-1), 1.0, atol=5e-3))
    # logits are constant along the broadcast (L) axis, as in the module.
    assert bool(jnp.allclose(logits, logits[:, :1, :], atol=1e-6))
    print("KERNEL_OK")
</pallas_src>

<mosaic_0001>
module attributes {stable_mosaic.version = 11 : i64} {
  func.func @fused_topic_backward_kernel(%arg0: memref<2x8x32xf32, #tpu.memory_space<vmem>>, %arg1: memref<32x64xf32, #tpu.memory_space<vmem>>, %arg2: memref<16x64xf32, #tpu.memory_space<vmem>>, %arg3: memref<1x64xf32, #tpu.memory_space<vmem>>, %arg4: memref<128x32xf32, #tpu.memory_space<vmem>>, %arg5: memref<1x32xf32, #tpu.memory_space<vmem>>, %arg6: memref<32x16xf32, #tpu.memory_space<vmem>>, %arg7: memref<1x16xf32, #tpu.memory_space<vmem>>, %arg8: memref<16x8xf32, #tpu.memory_space<vmem>>, %arg9: memref<1x8xf32, #tpu.memory_space<vmem>>, %arg10: memref<2x8x8xf32, #tpu.memory_space<vmem>>, %arg11: memref<2x8x8xf32, #tpu.memory_space<vmem>>, %arg12: memref<2x8x8xf32, #tpu.memory_space<vmem>>) attributes {dimension_semantics = [], scalar_prefetch = 0 : i64, scratch_operands = 0 : i64, tpu.core_type = #tpu.core_type<tc>} {
    %c0 = arith.constant 0 : index
    %c0_0 = arith.constant 0 : index
    %c0_1 = arith.constant 0 : index
    %0 = vector.load %arg0[%c0, %c0_0, %c0_1] : memref<2x8x32xf32, #tpu.memory_space<vmem>>, vector<2x8x32xf32>
    %1 = vector.shape_cast %0 : vector<2x8x32xf32> to vector<16x32xf32>
    %c0_2 = arith.constant 0 : index
    %c0_3 = arith.constant 0 : index
    %2 = vector.load %arg1[%c0_2, %c0_3] : memref<32x64xf32, #tpu.memory_space<vmem>>, vector<32x64xf32>
    %cst = arith.constant dense<0.000000e+00> : vector<16x64xf32>
    %3 = tpu.matmul %1, %2, %cst {dimension_numbers = #tpu.dot_dimension_numbers<[1], [0], [0], [1], [0, 0, 1, 1], [], []>} : vector<16x32xf32>, vector<32x64xf32>, vector<16x64xf32> -> vector<16x64xf32>
    %c0_4 = arith.constant 0 : index
    %c0_5 = arith.constant 0 : index
    %4 = vector.load %arg3[%c0_4, %c0_5] : memref<1x64xf32, #tpu.memory_space<vmem>>, vector<1x64xf32>
    %5 = vector.broadcast %4 : vector<1x64xf32> to vector<16x64xf32>
    %6 = arith.addf %3, %5 : vector<16x64xf32>
    %7 = vector.shape_cast %6 : vector<16x64xf32> to vector<2x8x64xf32>
    %c0_6 = arith.constant 0 : index
    %c0_7 = arith.constant 0 : index
    %8 = vector.load %arg2[%c0_6, %c0_7] : memref<16x64xf32, #tpu.memory_space<vmem>>, vector<16x64xf32>
    %cst_8 = arith.constant 0.000000e+00 : f32
    %9 = vector.broadcast %cst_8 : f32 to vector<2x16xf32>
    %cst_9 = arith.constant 0.000000e+00 : f32
    %10 = vector.broadcast %cst_9 : f32 to vector<2x16xf32>
    %11 = vector.extract_strided_slice %7 {offsets = [0, 0, 0], sizes = [2, 1, 64], strides = [1, 1, 1]} : vector<2x8x64xf32> to vector<2x1x64xf32>
    %12 = vector.shape_cast %11 : vector<2x1x64xf32> to vector<2x64xf32>
    %cst_10 = arith.constant dense<0.000000e+00> : vector<2x64xf32>
    %13 = tpu.matmul %9, %8, %cst_10 {dimension_numbers = #tpu.dot_dimension_numbers<[1], [0], [0], [1], [0, 0, 1, 1], [], []>} : vector<2x16xf32>, vector<16x64xf32>, vector<2x64xf32> -> vector<2x64xf32>
    %14 = arith.addf %12, %13 : vector<2x64xf32>
    %15 = vector.extract_strided_slice %14 {offsets = [0, 0], sizes = [2, 16], strides = [1, 1]} : vector<2x64xf32> to vector<2x16xf32>
    %16 = arith.negf %15 : vector<2x16xf32>
    %17 = math.exp %16 : vector<2x16xf32>
    %cst_11 = arith.constant 1.000000e+00 : f32
    %18 = vector.broadcast %cst_11 : f32 to vector<2x16xf32>
    %19 = arith.addf %18, %17 : vector<2x16xf32>
    %20 = arith.divf %18, %19 : vector<2x16xf32>
    %21 = vector.extract_strided_slice %14 {offsets = [0, 16], sizes = [2, 16], strides = [1, 1]} : vector<2x64xf32> to vector<2x16xf32>
    %22 = arith.negf %21 : vector<2x16xf32>
    %23 = math.exp %22 : vector<2x16xf32>
    %cst_12 = arith.constant 1.000000e+00 : f32
    %24 = vector.broadcast %cst_12 : f32 to vector<2x16xf32>
    %25 = arith.addf %24, %23 : vector<2x16xf32>
    %26 = arith.divf %24, %25 : vector<2x16xf32>
    %27 = vector.extract_strided_slice %14 {offsets = [0, 32], sizes = [2, 16], strides = [1, 1]} : vector<2x64xf32> to vector<2x16xf32>
    %28 = math.tanh %27 : vector<2x16xf32>
    %29 = vector.extract_strided_slice %14 {offsets = [0, 48], sizes = [2, 16], strides = [1, 1]} : vector<2x64xf32> to vector<2x16xf32>
    %30 = arith.negf %29 : vector<2x16xf32>
    %31 = math.exp %30 : vector<2x16xf32>
    %cst_13 = arith.constant 1.000000e+00 : f32
    %32 = vector.broadcast %cst_13 : f32 to vector<2x16xf32>
    %33 = arith.addf %32, %31 : vector<2x16xf32>
    %34 = arith.divf %32, %33 : vector<2x16xf32>
    %35 = arith.mulf %26, %10 : vector<2x16xf32>
    %36 = arith.mulf %20, %28 : vector<2x16xf32>
    %37 = arith.addf %35, %36 : vector<2x16xf32>
    %38 = math.tanh %37 : vector<2x16xf32>
    %39 = arith.mulf %34, %38 : vector<2x16xf32>
    %40 = vector.extract_strided_slice %7 {offsets = [0, 1, 0], sizes = [2, 1, 64], strides = [1, 1, 1]} : vector<2x8x64xf32> to vector<2x1x64xf32>
    %41 = vector.shape_cast %40 : vector<2x1x64xf32> to vector<2x64xf32>
    %cst_14 = arith.constant dense<0.000000e+00> : vector<2x64xf32>
    %42 = tpu.matmul %39, %8, %cst_14 {dimension_numbers = #tpu.dot_dimension_numbers<[1], [0], [0], [1], [0, 0, 1, 1], [], []>} : vector<2x16xf32>, vector<16x64xf32>, vector<2x64xf32> -> vector<2x64xf32>
    %43 = arith.addf %41, %42 : vector<2x64xf32>
    %44 = vector.extract_strided_slice %43 {offsets = [0, 0], sizes = [2, 16], strides = [1, 1]} : vector<2x64xf32> to vector<2x16xf32>
    %45 = arith.negf %44 : vector<2x16xf32>
    %46 = math.exp %45 : vector<2x16xf32>
    %cst_15 = arith.constant 1.000000e+00 : f32
    %47 = vector.broadcast %cst_15 : f32 to vector<2x16xf32>
    %48 = arith.addf %47, %46 : vector<2x16xf32>
    %49 = arith.divf %47, %48 : vector<2x16xf32>
    %50 = vector.extract_strided_slice %43 {offsets = [0, 16], sizes = [2, 16], strides = [1, 1]} : vector<2x64xf32> to vector<2x16xf32>
    %51 = arith.negf %50 : vector<2x16xf32>
    %52 = math.exp %51 : vector<2x16xf32>
    %cst_16 = arith.constant 1.000000e+00 : f32
    %53 = vector.broadcast %cst_16 : f32 to vector<2x16xf32>
    %54 = arith.addf %53, %52 : vector<2x16xf32>
    %55 = arith.divf %53, %54 : vector<2x16xf32>
    %56 = vector.extract_strided_slice %43 {offsets = [0, 32], sizes = [2, 16], strides = [1, 1]} : vector<2x64xf32> to vector<2x16xf32>
    %57 = math.tanh %56 : vector<2x16xf32>
    %58 = vector.extract_strided_slice %43 {offsets = [0, 48], sizes = [2, 16], strides = [1, 1]} : vector<2x64xf32> to vector<2x16xf32>
    %59 = arith.negf %58 : vector<2x16xf32>
    %60 = math.exp %59 : vector<2x16xf32>
    %cst_17 = arith.constant 1.000000e+00 : f32
    %61 = vector.broadcast %cst_17 : f32 to vector<2x16xf32>
    %62 = arith.addf %61, %60 : vector<2x16xf32>
    %63 = arith.divf %61, %62 : vector<2x16xf32>
    %64 = arith.mulf %55, %37 : vector<2x16xf32>
    %65 = arith.mulf %49, %57 : vector<2x16xf32>
    %66 = arith.addf %64, %65 : vector<2x16xf32>
    %67 = math.tanh %66 : vector<2x16xf32>
    %68 = arith.mulf %63, %67 : vector<2x16xf32>
    %69 = vector.extract_strided_slice %7 {offsets = [0, 2, 0], sizes = [2, 1, 64], strides = [1, 1, 1]} : vector<2x8x64xf32> to vector<2x1x64xf32>
    %70 = vector.shape_cast %69 : vector<2x1x64xf32> to vector<2x64xf32>
    %cst_18 = arith.constant dense<0.000000e+00> : vector<2x64xf32>
    %71 = tpu.matmul %68, %8, %cst_18 {dimension_numbers = #tpu.dot_dimension_numbers<[1], [0], [0], [1], [0, 0, 1, 1], [], []>} : vector<2x16xf32>, vector<16x64xf32>, vector<2x64xf32> -> vector<2x64xf32>
    %72 = arith.addf %70, %71 : vector<2x64xf32>
    %73 = vector.extract_strided_slice %72 {offsets = [0, 0], sizes = [2, 16], strides = [1, 1]} : vector<2x64xf32> to vector<2x16xf32>
    %74 = arith.negf %73 : vector<2x16xf32>
    %75 = math.exp %74 : vector<2x16xf32>
    %cst_19 = arith.constant 1.000000e+00 : f32
    %76 = vector.broadcast %cst_19 : f32 to vector<2x16xf32>
    %77 = arith.addf %76, %75 : vector<2x16xf32>
    %78 = arith.divf %76, %77 : vector<2x16xf32>
    %79 = vector.extract_strided_slice %72 {offsets = [0, 16], sizes = [2, 16], strides = [1, 1]} : vector<2x64xf32> to vector<2x16xf32>
    %80 = arith.negf %79 : vector<2x16xf32>
    %81 = math.exp %80 : vector<2x16xf32>
    %cst_20 = arith.constant 1.000000e+00 : f32
    %82 = vector.broadcast %cst_20 : f32 to vector<2x16xf32>
    %83 = arith.addf %82, %81 : vector<2x16xf32>
    %84 = arith.divf %82, %83 : vector<2x16xf32>
    %85 = vector.extract_strided_slice %72 {offsets = [0, 32], sizes = [2, 16], strides = [1, 1]} : vector<2x64xf32> to vector<2x16xf32>
    %86 = math.tanh %85 : vector<2x16xf32>
    %87 = vector.extract_strided_slice %72 {offsets = [0, 48], sizes = [2, 16], strides = [1, 1]} : vector<2x64xf32> to vector<2x16xf32>
    %88 = arith.negf %87 : vector<2x16xf32>
    %89 = math.exp %88 : vector<2x16xf32>
    %cst_21 = arith.constant 1.000000e+00 : f32
    %90 = vector.broadcast %cst_21 : f32 to vector<2x16xf32>
    %91 = arith.addf %90, %89 : vector<2x16xf32>
    %92 = arith.divf %90, %91 : vector<2x16xf32>
    %93 = arith.mulf %84, %66 : vector<2x16xf32>
    %94 = arith.mulf %78, %86 : vector<2x16xf32>
    %95 = arith.addf %93, %94 : vector<2x16xf32>
    %96 = math.tanh %95 : vector<2x16xf32>
    %97 = arith.mulf %92, %96 : vector<2x16xf32>
    %98 = vector.extract_strided_slice %7 {offsets = [0, 3, 0], sizes = [2, 1, 64], strides = [1, 1, 1]} : vector<2x8x64xf32> to vector<2x1x64xf32>
    %99 = vector.shape_cast %98 : vector<2x1x64xf32> to vector<2x64xf32>
    %cst_22 = arith.constant dense<0.000000e+00> : vector<2x64xf32>
    %100 = tpu.matmul %97, %8, %cst_22 {dimension_numbers = #tpu.dot_dimension_numbers<[1], [0], [0], [1], [0, 0, 1, 1], [], []>} : vector<2x16xf32>, vector<16x64xf32>, vector<2x64xf32> -> vector<2x64xf32>
    %101 = arith.addf %99, %100 : vector<2x64xf32>
    %102 = vector.extract_strided_slice %101 {offsets = [0, 0], sizes = [2, 16], strides = [1, 1]} : vector<2x64xf32> to vector<2x16xf32>
    %103 = arith.negf %102 : vector<2x16xf32>
    %104 = math.exp %103 : vector<2x16xf32>
    %cst_23 = arith.constant 1.000000e+00 : f32
    %105 = vector.broadcast %cst_23 : f32 to vector<2x16xf32>
    %106 = arith.addf %105, %104 : vector<2x16xf32>
    %107 = arith.divf %105, %106 : vector<2x16xf32>
    %108 = vector.extract_strided_slice %101 {offsets = [0, 16], sizes = [2, 16], strides = [1, 1]} : vector<2x64xf32> to vector<2x16xf32>
    %109 = arith.negf %108 : vector<2x16xf32>
    %110 = math.exp %109 : vector<2x16xf32>
    %cst_24 = arith.constant 1.000000e+00 : f32
    %111 = vector.broadcast %cst_24 : f32 to vector<2x16xf32>
    %112 = arith.addf %111, %110 : vector<2x16xf32>
    %113 = arith.divf %111, %112 : vector<2x16xf32>
    %114 = vector.extract_strided_slice %101 {offsets = [0, 32], sizes = [2, 16], strides = [1, 1]} : vector<2x64xf32> to vector<2x16xf32>
    %115 = math.tanh %114 : vector<2x16xf32>
    %116 = vector.extract_strided_slice %101 {offsets = [0, 48], sizes = [2, 16], strides = [1, 1]} : vector<2x64xf32> to vector<2x16xf32>
    %117 = arith.negf %116 : vector<2x16xf32>
    %118 = math.exp %117 : vector<2x16xf32>
    %cst_25 = arith.constant 1.000000e+00 : f32
    %119 = vector.broadcast %cst_25 : f32 to vector<2x16xf32>
    %120 = arith.addf %119, %118 : vector<2x16xf32>
    %121 = arith.divf %119, %120 : vector<2x16xf32>
    %122 = arith.mulf %113, %95 : vector<2x16xf32>
    %123 = arith.mulf %107, %115 : vector<2x16xf32>
    %124 = arith.addf %122, %123 : vector<2x16xf32>
    %125 = math.tanh %124 : vector<2x16xf32>
    %126 = arith.mulf %121, %125 : vector<2x16xf32>
    %127 = vector.extract_strided_slice %7 {offsets = [0, 4, 0], sizes = [2, 1, 64], strides = [1, 1, 1]} : vector<2x8x64xf32> to vector<2x1x64xf32>
    %128 = vector.shape_cast %127 : vector<2x1x64xf32> to vector<2x64xf32>
    %cst_26 = arith.constant dense<0.000000e+00> : vector<2x64xf32>
    %129 = tpu.matmul %126, %8, %cst_26 {dimension_numbers = #tpu.dot_dimension_numbers<[1], [0], [0], [1], [0, 0, 1, 1], [], []>} : vector<2x16xf32>, vector<16x64xf32>, vector<2x64xf32> -> vector<2x64xf32>
    %130 = arith.addf %128, %129 : vector<2x64xf32>
    %131 = vector.extract_strided_slice %130 {offsets = [0, 0], sizes = [2, 16], strides = [1, 1]} : vector<2x64xf32> to vector<2x16xf32>
    %132 = arith.negf %131 : vector<2x16xf32>
    %133 = math.exp %132 : vector<2x16xf32>
    %cst_27 = arith.constant 1.000000e+00 : f32
    %134 = vector.broadcast %cst_27 : f32 to vector<2x16xf32>
    %135 = arith.addf %134, %133 : vector<2x16xf32>
    %136 = arith.divf %134, %135 : vector<2x16xf32>
    %137 = vector.extract_strided_slice %130 {offsets = [0, 16], sizes = [2, 16], strides = [1, 1]} : vector<2x64xf32> to vector<2x16xf32>
    %138 = arith.negf %137 : vector<2x16xf32>
    %139 = math.exp %138 : vector<2x16xf32>
    %cst_28 = arith.constant 1.000000e+00 : f32
    %140 = vector.broadcast %cst_28 : f32 to vector<2x16xf32>
    %141 = arith.addf %140, %139 : vector<2x16xf32>
    %142 = arith.divf %140, %141 : vector<2x16xf32>
    %143 = vector.extract_strided_slice %130 {offsets = [0, 32], sizes = [2, 16], strides = [1, 1]} : vector<2x64xf32> to vector<2x16xf32>
    %144 = math.tanh %143 : vector<2x16xf32>
    %145 = vector.extract_strided_slice %130 {offsets = [0, 48], sizes = [2, 16], strides = [1, 1]} : vector<2x64xf32> to vector<2x16xf32>
    %146 = arith.negf %145 : vector<2x16xf32>
    %147 = math.exp %146 : vector<2x16xf32>
    %cst_29 = arith.constant 1.000000e+00 : f32
    %148 = vector.broadcast %cst_29 : f32 to vector<2x16xf32>
    %149 = arith.addf %148, %147 : vector<2x16xf32>
    %150 = arith.divf %148, %149 : vector<2x16xf32>
    %151 = arith.mulf %142, %124 : vector<2x16xf32>
    %152 = arith.mulf %136, %144 : vector<2x16xf32>
    %153 = arith.addf %151, %152 : vector<2x16xf32>
    %154 = math.tanh %153 : vector<2x16xf32>
    %155 = arith.mulf %150, %154 : vector<2x16xf32>
    %156 = vector.extract_strided_slice %7 {offsets = [0, 5, 0], sizes = [2, 1, 64], strides = [1, 1, 1]} : vector<2x8x64xf32> to vector<2x1x64xf32>
    %157 = vector.shape_cast %156 : vector<2x1x64xf32> to vector<2x64xf32>
    %cst_30 = arith.constant dense<0.000000e+00> : vector<2x64xf32>
    %158 = tpu.matmul %155, %8, %cst_30 {dimension_numbers = #tpu.dot_dimension_numbers<[1], [0], [0], [1], [0, 0, 1, 1], [], []>} : vector<2x16xf32>, vector<16x64xf32>, vector<2x64xf32> -> vector<2x64xf32>
    %159 = arith.addf %157, %158 : vector<2x64xf32>
    %160 = vector.extract_strided_slice %159 {offsets = [0, 0], sizes = [2, 16], strides = [1, 1]} : vector<2x64xf32> to vector<2x16xf32>
    %161 = arith.negf %160 : vector<2x16xf32>
    %162 = math.exp %161 : vector<2x16xf32>
    %cst_31 = arith.constant 1.000000e+00 : f32
    %163 = vector.broadcast %cst_31 : f32 to vector<2x16xf32>
    %164 = arith.addf %163, %162 : vector<2x16xf32>
    %165 = arith.divf %163, %164 : vector<2x16xf32>
    %166 = vector.extract_strided_slice %159 {offsets = [0, 16], sizes = [2, 16], strides = [1, 1]} : vector<2x64xf32> to vector<2x16xf32>
    %167 = arith.negf %166 : vector<2x16xf32>
    %168 = math.exp %167 : vector<2x16xf32>
    %cst_32 = arith.constant 1.000000e+00 : f32
    %169 = vector.broadcast %cst_32 : f32 to vector<2x16xf32>
    %170 = arith.addf %169, %168 : vector<2x16xf32>
    %171 = arith.divf %169, %170 : vector<2x16xf32>
    %172 = vector.extract_strided_slice %159 {offsets = [0, 32], sizes = [2, 16], strides = [1, 1]} : vector<2x64xf32> to vector<2x16xf32>
    %173 = math.tanh %172 : vector<2x16xf32>
    %174 = vector.extract_strided_slice %159 {offsets = [0, 48], sizes = [2, 16], strides = [1, 1]} : vector<2x64xf32> to vector<2x16xf32>
    %175 = arith.negf %174 : vector<2x16xf32>
    %176 = math.exp %175 : vector<2x16xf32>
    %cst_33 = arith.constant 1.000000e+00 : f32
    %177 = vector.broadcast %cst_33 : f32 to vector<2x16xf32>
    %178 = arith.addf %177, %176 : vector<2x16xf32>
    %179 = arith.divf %177, %178 : vector<2x16xf32>
    %180 = arith.mulf %171, %153 : vector<2x16xf32>
    %181 = arith.mulf %165, %173 : vector<2x16xf32>
    %182 = arith.addf %180, %181 : vector<2x16xf32>
    %183 = math.tanh %182 : vector<2x16xf32>
    %184 = arith.mulf %179, %183 : vector<2x16xf32>
    %185 = vector.extract_strided_slice %7 {offsets = [0, 6, 0], sizes = [2, 1, 64], strides = [1, 1, 1]} : vector<2x8x64xf32> to vector<2x1x64xf32>
    %186 = vector.shape_cast %185 : vector<2x1x64xf32> to vector<2x64xf32>
    %cst_34 = arith.constant dense<0.000000e+00> : vector<2x64xf32>
    %187 = tpu.matmul %184, %8, %cst_34 {dimension_numbers = #tpu.dot_dimension_numbers<[1], [0], [0], [1], [0, 0, 1, 1], [], []>} : vector<2x16xf32>, vector<16x64xf32>, vector<2x64xf32> -> vector<2x64xf32>
    %188 = arith.addf %186, %187 : vector<2x64xf32>
    %189 = vector.extract_strided_slice %188 {offsets = [0, 0], sizes = [2, 16], strides = [1, 1]} : vector<2x64xf32> to vector<2x16xf32>
    %190 = arith.negf %189 : vector<2x16xf32>
    %191 = math.exp %190 : vector<2x16xf32>
    %cst_35 = arith.constant 1.000000e+00 : f32
    %192 = vector.broadcast %cst_35 : f32 to vector<2x16xf32>
    %193 = arith.addf %192, %191 : vector<2x16xf32>
    %194 = arith.divf %192, %193 : vector<2x16xf32>
    %195 = vector.extract_strided_slice %188 {offsets = [0, 16], sizes = [2, 16], strides = [1, 1]} : vector<2x64xf32> to vector<2x16xf32>
    %196 = arith.negf %195 : vector<2x16xf32>
    %197 = math.exp %196 : vector<2x16xf32>
    %cst_36 = arith.constant 1.000000e+00 : f32
    %198 = vector.broadcast %cst_36 : f32 to vector<2x16xf32>
    %199 = arith.addf %198, %197 : vector<2x16xf32>
    %200 = arith.divf %198, %199 : vector<2x16xf32>
    %201 = vector.extract_strided_slice %188 {offsets = [0, 32], sizes = [2, 16], strides = [1, 1]} : vector<2x64xf32> to vector<2x16xf32>
    %202 = math.tanh %201 : vector<2x16xf32>
    %203 = vector.extract_strided_slice %188 {offsets = [0, 48], sizes = [2, 16], strides = [1, 1]} : vector<2x64xf32> to vector<2x16xf32>
    %204 = arith.negf %203 : vector<2x16xf32>
    %205 = math.exp %204 : vector<2x16xf32>
    %cst_37 = arith.constant 1.000000e+00 : f32
    %206 = vector.broadcast %cst_37 : f32 to vector<2x16xf32>
    %207 = arith.addf %206, %205 : vector<2x16xf32>
    %208 = arith.divf %206, %207 : vector<2x16xf32>
    %209 = arith.mulf %200, %182 : vector<2x16xf32>
    %210 = arith.mulf %194, %202 : vector<2x16xf32>
    %211 = arith.addf %209, %210 : vector<2x16xf32>
    %212 = math.tanh %211 : vector<2x16xf32>
    %213 = arith.mulf %208, %212 : vector<2x16xf32>
    %214 = vector.extract_strided_slice %7 {offsets = [0, 7, 0], sizes = [2, 1, 64], strides = [1, 1, 1]} : vector<2x8x64xf32> to vector<2x1x64xf32>
    %215 = vector.shape_cast %214 : vector<2x1x64xf32> to vector<2x64xf32>
    %cst_38 = arith.constant dense<0.000000e+00> : vector<2x64xf32>
    %216 = tpu.matmul %213, %8, %cst_38 {dimension_numbers = #tpu.dot_dimension_numbers<[1], [0], [0], [1], [0, 0, 1, 1], [], []>} : vector<2x16xf32>, vector<16x64xf32>, vector<2x64xf32> -> vector<2x64xf32>
    %217 = arith.addf %215, %216 : vector<2x64xf32>
    %218 = vector.extract_strided_slice %217 {offsets = [0, 0], sizes = [2, 16], strides = [1, 1]} : vector<2x64xf32> to vector<2x16xf32>
    %219 = arith.negf %218 : vector<2x16xf32>
    %220 = math.exp %219 : vector<2x16xf32>
    %cst_39 = arith.constant 1.000000e+00 : f32
    %221 = vector.broadcast %cst_39 : f32 to vector<2x16xf32>
    %222 = arith.addf %221, %220 : vector<2x16xf32>
    %223 = arith.divf %221, %222 : vector<2x16xf32>
    %224 = vector.extract_strided_slice %217 {offsets = [0, 16], sizes = [2, 16], strides = [1, 1]} : vector<2x64xf32> to vector<2x16xf32>
    %225 = arith.negf %224 : vector<2x16xf32>
    %226 = math.exp %225 : vector<2x16xf32>
    %cst_40 = arith.constant 1.000000e+00 : f32
    %227 = vector.broadcast %cst_40 : f32 to vector<2x16xf32>
    %228 = arith.addf %227, %226 : vector<2x16xf32>
    %229 = arith.divf %227, %228 : vector<2x16xf32>
    %230 = vector.extract_strided_slice %217 {offsets = [0, 32], sizes = [2, 16], strides = [1, 1]} : vector<2x64xf32> to vector<2x16xf32>
    %231 = math.tanh %230 : vector<2x16xf32>
    %232 = vector.extract_strided_slice %217 {offsets = [0, 48], sizes = [2, 16], strides = [1, 1]} : vector<2x64xf32> to vector<2x16xf32>
    %233 = arith.negf %232 : vector<2x16xf32>
    %234 = math.exp %233 : vector<2x16xf32>
    %cst_41 = arith.constant 1.000000e+00 : f32
    %235 = vector.broadcast %cst_41 : f32 to vector<2x16xf32>
    %236 = arith.addf %235, %234 : vector<2x16xf32>
    %237 = arith.divf %235, %236 : vector<2x16xf32>
    %238 = arith.mulf %229, %211 : vector<2x16xf32>
    %239 = arith.mulf %223, %231 : vector<2x16xf32>
    %240 = arith.addf %238, %239 : vector<2x16xf32>
    %241 = math.tanh %240 : vector<2x16xf32>
    %242 = arith.mulf %237, %241 : vector<2x16xf32>
    %243 = tpu.concatenate %39, %68, %97, %126, %155, %184, %213, %242 in 1 : vector<2x16xf32>, vector<2x16xf32>, vector<2x16xf32>, vector<2x16xf32>, vector<2x16xf32>, vector<2x16xf32>, vector<2x16xf32>, vector<2x16xf32> -> vector<2x128xf32>
    %c0_42 = arith.constant 0 : index
    %c0_43 = arith.constant 0 : index
    %244 = vector.load %arg4[%c0_42, %c0_43] : memref<128x32xf32, #tpu.memory_space<vmem>>, vector<128x32xf32>
    %cst_44 = arith.constant dense<0.000000e+00> : vector<2x32xf32>
    %245 = tpu.matmul %243, %244, %cst_44 {dimension_numbers = #tpu.dot_dimension_numbers<[1], [0], [0], [1], [0, 0, 1, 1], [], []>} : vector<2x128xf32>, vector<128x32xf32>, vector<2x32xf32> -> vector<2x32xf32>
    %c0_45 = arith.constant 0 : index
    %c0_46 = arith.constant 0 : index
    %246 = vector.load %arg5[%c0_45, %c0_46] : memref<1x32xf32, #tpu.memory_space<vmem>>, vector<1x32xf32>
    %247 = vector.broadcast %246 : vector<1x32xf32> to vector<2x32xf32>
    %248 = arith.addf %245, %247 : vector<2x32xf32>
    %cst_47 = arith.constant 0.000000e+00 : f32
    %249 = vector.broadcast %cst_47 : f32 to vector<2x32xf32>
    %250 = arith.maximumf %248, %249 : vector<2x32xf32>
    %c0_48 = arith.constant 0 : index
    %c0_49 = arith.constant 0 : index
    %251 = vector.load %arg6[%c0_48, %c0_49] : memref<32x16xf32, #tpu.memory_space<vmem>>, vector<32x16xf32>
    %cst_50 = arith.constant dense<0.000000e+00> : vector<2x16xf32>
    %252 = tpu.matmul %250, %251, %cst_50 {dimension_numbers = #tpu.dot_dimension_numbers<[1], [0], [0], [1], [0, 0, 1, 1], [], []>} : vector<2x32xf32>, vector<32x16xf32>, vector<2x16xf32> -> vector<2x16xf32>
    %c0_51 = arith.constant 0 : index
    %c0_52 = arith.constant 0 : index
    %253 = vector.load %arg7[%c0_51, %c0_52] : memref<1x16xf32, #tpu.memory_space<vmem>>, vector<1x16xf32>
    %254 = vector.broadcast %253 : vector<1x16xf32> to vector<2x16xf32>
    %255 = arith.addf %252, %254 : vector<2x16xf32>
    %cst_53 = arith.constant 0.000000e+00 : f32
    %256 = vector.broadcast %cst_53 : f32 to vector<2x16xf32>
    %257 = arith.maximumf %255, %256 : vector<2x16xf32>
    %c0_54 = arith.constant 0 : index
    %c0_55 = arith.constant 0 : index
    %258 = vector.load %arg8[%c0_54, %c0_55] : memref<16x8xf32, #tpu.memory_space<vmem>>, vector<16x8xf32>
    %cst_56 = arith.constant dense<0.000000e+00> : vector<2x8xf32>
    %259 = tpu.matmul %257, %258, %cst_56 {dimension_numbers = #tpu.dot_dimension_numbers<[1], [0], [0], [1], [0, 0, 1, 1], [], []>} : vector<2x16xf32>, vector<16x8xf32>, vector<2x8xf32> -> vector<2x8xf32>
    %c0_57 = arith.constant 0 : index
    %c0_58 = arith.constant 0 : index
    %260 = vector.load %arg9[%c0_57, %c0_58] : memref<1x8xf32, #tpu.memory_space<vmem>>, vector<1x8xf32>
    %261 = vector.broadcast %260 : vector<1x8xf32> to vector<2x8xf32>
    %262 = arith.addf %259, %261 : vector<2x8xf32>
    %263 = vector.shape_cast %262 : vector<2x8xf32> to vector<2x1x8xf32>
    %264 = vector.shape_cast %263 : vector<2x1x8xf32> to vector<2x1x8xf32>
    %265 = vector.broadcast %264 : vector<2x1x8xf32> to vector<2x8x8xf32>
    %c0_59 = arith.constant 0 : index
    %c0_60 = arith.constant 0 : index
    %c0_61 = arith.constant 0 : index
    %266 = vector.load %arg12[%c0_59, %c0_60, %c0_61] : memref<2x8x8xf32, #tpu.memory_space<vmem>>, vector<2x8x8xf32>
    tpu.vector_store %arg12[%c0_59, %c0_60, %c0_61], %265 {strides = array<i32>} : memref<2x8x8xf32, #tpu.memory_space<vmem>>, vector<2x8x8xf32>,
    %c0_62 = arith.constant 0 : index
    %c0_63 = arith.constant 0 : index
    %c0_64 = arith.constant 0 : index
    %267 = vector.load %arg10[%c0_62, %c0_63, %c0_64] : memref<2x8x8xf32, #tpu.memory_space<vmem>>, vector<2x8x8xf32>
    %268 = math.log %267 : vector<2x8x8xf32>
    %cst_65 = arith.constant 0.000000e+00 : f32
    %269 = vector.broadcast %cst_65 : f32 to vector<2x8x8xf32>
    %270 = arith.subf %269, %268 : vector<2x8x8xf32>
    %271 = math.log %270 : vector<2x8x8xf32>
    %cst_66 = arith.constant 0.000000e+00 : f32
    %272 = vector.broadcast %cst_66 : f32 to vector<2x8x8xf32>
    %273 = arith.subf %272, %271 : vector<2x8x8xf32>
    %274 = arith.addf %265, %273 : vector<2x8x8xf32>
    %cst_67 = arith.constant 2.000000e+00 : f32
    %275 = vector.broadcast %cst_67 : f32 to vector<2x8x8xf32>
    %276 = arith.mulf %274, %275 : vector<2x8x8xf32>
    %cst_68 = arith.constant dense<0xFF800000> : vector<2x8xf32>
    %277 = vector.multi_reduction <maximumf>, %276, %cst_68 [2] : vector<2x8x8xf32> to vector<2x8xf32>
    %278 = vector.shape_cast %277 : vector<2x8xf32> to vector<2x8x1xf32>
    %279 = vector.broadcast %278 : vector<2x8x1xf32> to vector<2x8x8xf32>
    %280 = arith.subf %276, %279 : vector<2x8x8xf32>
    %281 = math.exp %280 : vector<2x8x8xf32>
    %cst_69 = arith.constant dense<0.000000e+00> : vector<2x8xf32>
    %282 = vector.multi_reduction <add>, %281, %cst_69 [2] : vector<2x8x8xf32> to vector<2x8xf32>
    %283 = vector.shape_cast %282 : vector<2x8xf32> to vector<2x8x1xf32>
    %cst_70 = arith.constant 1.000000e+00 : f32
    %284 = vector.broadcast %cst_70 : f32 to vector<2x8x1xf32>
    %285 = arith.divf %284, %283 : vector<2x8x1xf32>
    %286 = vector.broadcast %285 : vector<2x8x1xf32> to vector<2x8x8xf32>
    %287 = arith.mulf %281, %286 : vector<2x8x8xf32>
    %c0_71 = arith.constant 0 : index
    %c0_72 = arith.constant 0 : index
    %c0_73 = arith.constant 0 : index
    %288 = vector.load %arg11[%c0_71, %c0_72, %c0_73] : memref<2x8x8xf32, #tpu.memory_space<vmem>>, vector<2x8x8xf32>
    tpu.vector_store %arg11[%c0_71, %c0_72, %c0_73], %287 {strides = array<i32>} : memref<2x8x8xf32, #tpu.memory_space<vmem>>, vector<2x8x8xf32>,
    return
  }
}

</mosaic_0001>

<bundles_post_ra>
// kernel: tpu_custom_call.1
= control target key start
LH: loop header
LB: loop body
LE: loop exit
PB: predicated region body
PF: predicated region fallthrough
CT: control target
= control target key end

     0   :  { %18 = vsyncpa [#allocation3], 0  ;;  %vm55_vm0 = vcmask 261120   ;;  %v2133_v6 = vmov 0.0|0.0   ;;  %vm2134_vm1 = vmmov 0   ;;  %v2135_v10 = vmov 0.0   ;;  %s2548_s0 = inlined_call_operand.vmem [shape: f32[2,8,32], index: 0, kind: input, shape index: {}]   ;;  %s2549_s1 = inlined_call_operand.vmem [shape: f32[32,64], index: 1, kind: input, shape index: {}]   ;;  %s2550_s2 = inlined_call_operand.vmem [shape: f32[16,64], index: 2, kind: input, shape index: {}]   ;;  %s2551_s3 = inlined_call_operand.vmem [shape: f32[1,64], index: 3, kind: input, shape index: {}]   ;;  %s2552_s4 = inlined_call_operand.vmem [shape: f32[128,32], index: 4, kind: input, shape index: {}]   ;;  %s2553_s5 = inlined_call_operand.vmem [shape: f32[1,32], index: 5, kind: input, shape index: {}]   ;;  %s2554_s6 = inlined_call_operand.vmem [shape: f32[32,16], index: 6, kind: input, shape index: {}]   ;;  %s2555_s7 = inlined_call_operand.vmem [shape: f32[1,16], index: 7, kind: input, shape index: {}]   ;;  %s2556_s8 = inlined_call_operand.vmem [shape: f32[16,8], index: 8, kind: input, shape index: {}]   ;;  %s2557_s9 = inlined_call_operand.vmem [shape: f32[1,8], index: 9, kind: input, shape index: {}]   ;;  %s2558_s10 = inlined_call_operand.vmem [shape: f32[2,8,8], index: 10, kind: input, shape index: {}]   ;;  %s2559_s11 = inlined_call_operand.hbm [shape: f32[2,8,8], index: 11, kind: output, shape index: {0}]   ;;  %s2560_s12 = inlined_call_operand.hbm [shape: f32[2,8,8], index: 12, kind: output, shape index: {1}]  }
   0x1   :  { %v44_v0 = vld [vmem:[%s2549_s1] sm:$0xff]  ;;  %v45_v1 = vld [vmem:[%s2549_s1 + $0x8] sm:$0xff]  ;;  %v46_v2 = vld [vmem:[%s2549_s1 + $0x10] sm:$0xff]  ;;  %1875 = vmatprep.subr.bf16.mxu0 %v2133_v6  ;;  %1770 = vmatprep.mubr.msk.f32.mxu0 %vm2134_vm1, %v2135_v10 }
   0x2   :  { %v1861_v3 = vpack.c.bf16 %v45_v1, %v44_v0  ;;  %v47_v4 = vld [vmem:[%s2549_s1 + $0x18] sm:$0xff]  ;;  %v42_v5 = vld [vmem:[%s2548_s0] sm:$0xff]  ;;  %v138_v9 = vld [vmem:[%s2550_s2 + $0x8] sm:$0xff] }
   0x3   :  { %v1865_v7 = vpack.c.bf16 %v47_v4, %v46_v2  ;;  %1749 = vmatprep.mubr.msk.f32.mxu1 %vm55_vm0, %v42_v5  ;;  %v137_v8 = vld [vmem:[%s2550_s2] sm:$0xff] }
   0x4   :  { %19 = vsyncpa [#allocation5], 0  ;;  %1862 = vmatprep.subr.bf16.mxu1 %v1861_v3  ;;  %v2238_v11 = vpack.c.bf16 %v138_v9, %v137_v8  ;;  %v43_v12 = vld [vmem:[%s2548_s0 + $0x8] sm:$0xff]  ;;  %v1655_v15 = vld [vmem:[%s2551_s3] ss:$0 sm:$0xff]  ;;  %s2136_s18 = smov 96  }
   0x5   :  { %1864 = vmatpush3.bf16.msra.mxu1 %v1861_v3  ;;  %s2137_s3 = smov 16   ;;  %s2138_s19 = smov 32   ;;  %vm270_vm2 = vcmask 1041409   ;;  %vm139_vm3 = vcmask 130048   ;;  %vm1272_vm4 = vcmask 392192   ;;  %vm1274_vm5 = vcmask 523264  }
   0x6   :  { %1866 = vmatprep.subr.bf16.mxu1 %v1865_v7  ;;  %1877 = vmatpush3.bf16.msra.mxu0 %v2238_v11  ;;  %s2139_s20 = smov 80   ;;  %s2140_s15 = smov 112   ;;  %vm1276_vm6 = vcmask 654336   ;;  %vm1278_vm7 = vcmask 785408   ;;  %vm1280_vm8 = vcmask 916480   ;;  %vm1576_vm9 = vcmask 64512  }
   0x7   :  { %1881 = vmatprep.subr.bf16.mxu0 %v2133_v6  ;;  %s2141_s22 = smov 48  }
   0x9   :  { %1868 = vmatpush3.bf16.msra.mxu1 %v1865_v7 }
   0xa   :  { %1869 = vmatprep.subr.bf16.mxu1 %v2133_v6 }
   0xc   :  { %1750 = vmatmul.mubr.msk.f32.vlgmr.msra.gmra.mrb[0].mxu1 %vm55_vm0, %v43_v12 }
   0xd   :  { %1871 = vmatpush3.bf16.msra.mxu1 %v2238_v11  ;;  %1756 = vmatprep.mubr.msk.f32.mxu1 %vm2134_vm1, %v2135_v10 }
   0xe   :  { %1872 = vmatprep.subr.bf16.mxu1 %v2133_v6 }
  0x10   :  { %1757 = vmatmul.mubr.f32.vlgmr.msra.gmra.mrb[2].mxu1 %v2135_v10 }
  0x11   :  { %1874 = vmatpush3.bf16.msra.mxu1 %v2238_v11  ;;  %1763 = vmatprep.mubr.msk.f32.mxu1 %vm2134_vm1, %v2135_v10 }
  0x12   :  { %1878 = vmatprep.subr.bf16.mxu1 %v2133_v6 }
  0xdf   :  { %v1751_v13 = vpop.f32.mrb[0].mxu1 }
  0xe0   :  { %v128_v14 = vpop.f32.mrb[1].mxu1  ;;  %v2259_v17 = vadd.f32 %v1751_v13, %v1655_v15 }
  0xe1   :  { %v2261_v20 = vadd.f32 %v1655_v15, %v128_v14 }
  0xe3   :  { %v209_v16 = vpop.f32.mrb[2].mxu1 }
  0xe4   :  { %v214_v18 = vrot.slane %v209_v16, 1  ;;  %v1758_v19 = vpop.f32.mrb[3].mxu1  ;;  %v217_v22 = vadd.f32 %v209_v16, %v2261_v20 }
  0xe6   :  { %v218_v21 = vadd.f32 %v214_v18, %v2259_v17  ;;  %v1658_v26 = vmul.f32 -1.442695, %v217_v22 }
  0xe8   :  { %1941 = vtanh.f32 %v218_v21  ;;  %v1659_v25 = vmul.f32 -1.442695, %v218_v21 }
  0xe9   :  { %1943 = vtanh.f32 %v217_v22 }
  0xea   :  { %1945 = vpow2.f32 %v1659_v25 }
  0xeb   :  { %1947 = vpow2.f32 %v1658_v26 }
  0xf2   :  { %v1942_v23 = vpop.eup %1941 }
  0xf3   :  { %239 = vrot.lane.b32.xlu0 %v1942_v23, %s2136_s18  ;;  %v1944_v24 = vpop.eup %1943 }
  0xf4   :  { %v1946_v27 = vpop.eup %1945 }
  0xf5   :  { %v226_v28 = vadd.f32 1.0, %v1946_v27  ;;  %v1948_v29 = vpop.eup %1947 }
  0xf6   :  { %v225_v30 = vadd.f32 1.0, %v1948_v29 }
  0xf7   :  { %237 = vrot.lane.b32.xlu0 %v1944_v24, %s2136_s18  ;;  %1949 = vrcp.f32 %v226_v28 }
  0xf8   :  { %1951 = vrcp.f32 %v225_v30 }
 0x101   :  { %v1950_v31 = vpop.eup %1949 }
 0x102   :  { %v1952_v34 = vpop.eup %1951  ;;  %v234_v37 = vmul.f32 0.0, %v1950_v31 }
 0x103   :  { %v233_v40 = vmul.f32 0.0, %v1952_v34 }
 0x165   :  { %v240_v32 = vpop.permute.xlu0 %239 }
 0x166   :  { %v244_v33 = vmul.f32 %v1950_v31, %v240_v32 }
 0x168   :  { %249 = vrot.lane.b32.xlu1 %v244_v33, %s2137_s3 }
 0x169   :  { %v238_v35 = vpop.permute.xlu0 %237 }
 0x16a   :  { %v243_v36 = vmul.f32 %v1952_v34, %v238_v35 }
 0x16c   :  { %247 = vrot.lane.b32.xlu1 %v243_v36, %s2137_s3 }
 0x1da   :  { %v250_v38 = vpop.permute.xlu1 %249 }
 0x1db   :  { %v254_v39 = vadd.f32 %v250_v38, %v234_v37 }
 0x1dd   :  { %1953 = vtanh.f32 %v254_v39  ;;  %v369_v8 = vrot.slane %v254_v39, 7 }
 0x1de   :  { %v248_v41 = vpop.permute.xlu1 %247 }
 0x1df   :  { %v253_v42 = vadd.f32 %v248_v41, %v233_v40 }
 0x1e1   :  { %1955 = vtanh.f32 %v253_v42  ;;  %v368_v12 = vrot.slane %v253_v42, 7 }
 0x1e7   :  { %v1954_v43 = vpop.eup %1953 }
 0x1e8   :  { %261 = vrot.lane.b32.xlu0 %v1954_v43, %s2138_s19 }
 0x1eb   :  { %v1956_v44 = vpop.eup %1955 }
 0x1ec   :  { %259 = vrot.lane.b32.xlu1 %v1956_v44, %s2138_s19 }
 0x25a   :  { %v262_v45 = vpop.permute.xlu0 %261 }
 0x25b   :  { %v266_v46 = vmul.f32 %v1950_v31, %v262_v45 }
 0x25d   :  { %v269_v48 = vrot.slane %v266_v46, 7 }
 0x25e   :  { %v260_v47 = vpop.permute.xlu1 %259 }
 0x25f   :  { %v265_v49 = vmul.f32 %v1952_v34, %v260_v47 }
 0x261   :  { %v271_v50 = vsel %vm270_vm2, %v269_v48, %v265_v49 }
 0x262   :  { %272 = vrot.lane.b32.xlu0 %v271_v50, %s2139_s20 }
 0x2d4   :  { %v2273_v51 = vpop.permute.xlu0 %272 }
 0x2d5   :  { %1764 = vmatmul.mubr.msk.f32.vlgmr.msra.gmra.mrb[4].mxu1 %vm139_vm3, %v2273_v51 }
 0x2d6   :  { %1880 = vmatpush3.bf16.msra.mxu1 %v2238_v11  ;;  %1777 = vmatprep.mubr.msk.f32.mxu1 %vm2134_vm1, %v2135_v10 }
 0x2d7   :  { %1884 = vmatprep.subr.bf16.mxu1 %v2133_v6 }
 0x3a8   :  { %v342_v52 = vpop.f32.mrb[4].mxu1 }
 0x3a9   :  { %v347_v53 = vrot.slane %v342_v52, 7  ;;  %v351_v54 = vadd.f32 %v342_v52, %v2259_v17  ;;  %v1765_v55 = vpop.f32.mrb[5].mxu1 }
 0x3ab   :  { %v350_v56 = vadd.f32 %v347_v53, %v2261_v20  ;;  %1957 = vtanh.f32 %v351_v54  ;;  %v1662_v59 = vmul.f32 -1.442695, %v351_v54 }
 0x3ad   :  { %1959 = vtanh.f32 %v350_v56  ;;  %v1661_v60 = vmul.f32 -1.442695, %v350_v56 }
 0x3ae   :  { %1961 = vpow2.f32 %v1662_v59 }
 0x3af   :  { %1963 = vpow2.f32 %v1661_v60 }
 0x3b5   :  { %v1958_v57 = vpop.eup %1957 }
 0x3b6   :  { %378 = vrot.lane.b32.xlu0 %v1958_v57, %s2136_s18 }
 0x3b7   :  { %v1960_v58 = vpop.eup %1959 }
 0x3b8   :  { %376 = vrot.lane.b32.xlu1 %v1960_v58, %s2136_s18  ;;  %v1962_v61 = vpop.eup %1961 }
 0x3b9   :  { %v1964_v62 = vpop.eup %1963  ;;  %v359_v63 = vadd.f32 1.0, %v1962_v61 }
 0x3ba   :  { %v358_v0 = vadd.f32 1.0, %v1964_v62 }
 0x3bb   :  { %1965 = vrcp.f32 %v359_v63 }
 0x3bc   :  { %1967 = vrcp.f32 %v358_v0 }
 0x3c5   :  { %v1966_v1 = vpop.eup %1965 }
 0x3c6   :  { %v1968_v4 = vpop.eup %1967  ;;  %v373_v9 = vmul.f32 %v1966_v1, %v369_v8 }
 0x3c7   :  { %v372_v15 = vmul.f32 %v1968_v4, %v368_v12 }
 0x428   :  { %v379_v2 = vpop.permute.xlu0 %378 }
 0x429   :  { %v383_v3 = vmul.f32 %v1966_v1, %v379_v2 }
 0x42a   :  { %v377_v5 = vpop.permute.xlu1 %376 }
 0x42b   :  { %388 = vrot.lane.b32.xlu0 %v383_v3, %s2137_s3  ;;  %v382_v7 = vmul.f32 %v1968_v4, %v377_v5 }
 0x42d   :  { %386 = vrot.lane.b32.xlu1 %v382_v7, %s2137_s3 }
 0x49d   :  { %v389_v13 = vpop.permute.xlu0 %388 }
 0x49e   :  { %v393_v14 = vadd.f32 %v389_v13, %v373_v9 }
 0x49f   :  { %v387_v16 = vpop.permute.xlu1 %386 }
 0x4a0   :  { %1969 = vtanh.f32 %v393_v14  ;;  %v392_v18 = vadd.f32 %v387_v16, %v372_v15  ;;  %v508_v50 = vrot.slane %v393_v14, 7 }
 0x4a2   :  { %1971 = vtanh.f32 %v392_v18  ;;  %v507_v49 = vrot.slane %v392_v18, 7 }
 0x4aa   :  { %v1970_v19 = vpop.eup %1969 }
 0x4ab   :  { %400 = vrot.lane.b32.xlu0 %v1970_v19, %s2138_s19 }
 0x4ac   :  { %v1972_v21 = vpop.eup %1971 }
 0x4ad   :  { %398 = vrot.lane.b32.xlu1 %v1972_v21, %s2138_s19 }
 0x51d   :  { %v401_v22 = vpop.permute.xlu0 %400 }
 0x51e   :  { %v405_v25 = vmul.f32 %v1966_v1, %v401_v22 }
 0x51f   :  { %v399_v23 = vpop.permute.xlu1 %398 }
 0x520   :  { %v404_v24 = vmul.f32 %v1968_v4, %v399_v23 }
 0x522   :  { %v408_v26 = vrot.slane %v404_v24, 1 }
 0x524   :  { %v2290_v27 = vsel %vm270_vm2, %v405_v25, %v408_v26 }
 0x525   :  { %410 = vrot.lane.b32.xlu1 %v2290_v27, %s2139_s20 }
 0x597   :  { %v411_v28 = vpop.permute.xlu1 %410 }
 0x598   :  { %1771 = vmatmul.mubr.msk.f32.vlgmr.msra.gmra.mrb[0].mxu0 %vm139_vm3, %v411_v28 }
 0x599   :  { %1883 = vmatpush3.bf16.msra.mxu0 %v2238_v11  ;;  %1784 = vmatprep.mubr.msk.f32.mxu0 %vm2134_vm1, %v2135_v10 }
 0x59a   :  { %1887 = vmatprep.subr.bf16.mxu0 %v2133_v6 }
 0x66b   :  { %v480_v29 = vpop.f32.mrb[0].mxu0 }
 0x66c   :  { %v485_v30 = vrot.slane %v480_v29, 6  ;;  %v486_v31 = vrot.slane %v480_v29, 7  ;;  %v1772_v32 = vpop.f32.mrb[1].mxu0 }
 0x66e   :  { %v489_v33 = vadd.f32 %v485_v30, %v2261_v20  ;;  %v490_v34 = vadd.f32 %v486_v31, %v2259_v17 }
 0x670   :  { %1973 = vtanh.f32 %v489_v33  ;;  %v1664_v37 = vmul.f32 -1.442695, %v489_v33  ;;  %v1665_v38 = vmul.f32 -1.442695, %v490_v34 }
 0x671   :  { %1975 = vtanh.f32 %v490_v34 }
 0x672   :  { %1977 = vpow2.f32 %v1664_v37 }
 0x673   :  { %1979 = vpow2.f32 %v1665_v38 }
 0x67a   :  { %v1974_v35 = vpop.eup %1973 }
 0x67b   :  { %v1976_v36 = vpop.eup %1975  ;;  %515 = vrot.lane.b32.xlu0 %v1974_v35, %s2136_s18 }
 0x67c   :  { %517 = vrot.lane.b32.xlu1 %v1976_v36, %s2136_s18  ;;  %v1978_v39 = vpop.eup %1977 }
 0x67d   :  { %v1980_v40 = vpop.eup %1979  ;;  %v497_v41 = vadd.f32 1.0, %v1978_v39 }
 0x67e   :  { %v498_v42 = vadd.f32 1.0, %v1980_v40 }
 0x67f   :  { %1981 = vrcp.f32 %v497_v41 }
 0x680   :  { %1983 = vrcp.f32 %v498_v42 }
 0x689   :  { %v1982_v43 = vpop.eup %1981 }
 0x68a   :  { %v1984_v45 = vpop.eup %1983  ;;  %v511_v52 = vmul.f32 %v1982_v43, %v507_v49 }
 0x68b   :  { %v512_v53 = vmul.f32 %v1984_v45, %v508_v50 }
 0x6ed   :  { %v516_v44 = vpop.permute.xlu0 %515 }
 0x6ee   :  { %v518_v46 = vpop.permute.xlu1 %517  ;;  %v521_v47 = vmul.f32 %v1982_v43, %v516_v44 }
 0x6ef   :  { %v522_v48 = vmul.f32 %v1984_v45, %v518_v46 }
 0x6f0   :  { %525 = vrot.lane.b32.xlu0 %v521_v47, %s2137_s3 }
 0x6f1   :  { %527 = vrot.lane.b32.xlu1 %v522_v48, %s2137_s3 }
 0x762   :  { %v526_v54 = vpop.permute.xlu0 %525 }
 0x763   :  { %v528_v55 = vpop.permute.xlu1 %527  ;;  %v531_v56 = vadd.f32 %v526_v54, %v511_v52 }
 0x764   :  { %v532_v57 = vadd.f32 %v528_v55, %v512_v53 }
 0x765   :  { %1985 = vtanh.f32 %v531_v56  ;;  %v647_v30 = vrot.slane %v531_v56, 7 }
 0x766   :  { %1987 = vtanh.f32 %v532_v57  ;;  %v648_v31 = vrot.slane %v532_v57, 7 }
 0x76f   :  { %v1986_v58 = vpop.eup %1985 }
 0x770   :  { %v1988_v59 = vpop.eup %1987  ;;  %537 = vrot.lane.b32.xlu0 %v1986_v58, %s2138_s19 }
 0x771   :  { %539 = vrot.lane.b32.xlu1 %v1988_v59, %s2138_s19 }
 0x7e2   :  { %v538_v60 = vpop.permute.xlu0 %537 }
 0x7e3   :  { %v540_v61 = vpop.permute.xlu1 %539  ;;  %v543_v62 = vmul.f32 %v1982_v43, %v538_v60 }
 0x7e4   :  { %v544_v63 = vmul.f32 %v1984_v45, %v540_v61 }
 0x7e5   :  { %v547_v0 = vrot.slane %v543_v62, 2 }
 0x7e6   :  { %v548_v1 = vrot.slane %v544_v63, 1 }
 0x7e8   :  { %v2308_v2 = vsel %vm270_vm2, %v548_v1, %v547_v0 }
 0x7e9   :  { %550 = vrot.lane.b32.xlu0 %v2308_v2, %s2139_s20 }
 0x85b   :  { %v551_v3 = vpop.permute.xlu0 %550 }
 0x85c   :  { %1778 = vmatmul.mubr.msk.f32.vlgmr.msra.gmra.mrb[6].mxu1 %vm139_vm3, %v551_v3 }
 0x85d   :  { %1886 = vmatpush3.bf16.msra.mxu1 %v2238_v11  ;;  %1791 = vmatprep.mubr.msk.f32.mxu1 %vm2134_vm1, %v2135_v10 }
 0x85e   :  { %1890 = vmatprep.subr.bf16.mxu1 %v2133_v6 }
 0x92f   :  { %v620_v4 = vpop.f32.mrb[6].mxu1 }
 0x930   :  { %v625_v5 = vrot.slane %v620_v4, 5  ;;  %v626_v7 = vrot.slane %v620_v4, 6  ;;  %v1779_v8 = vpop.f32.mrb[7].mxu1 }
 0x932   :  { %v629_v9 = vadd.f32 %v625_v5, %v2261_v20  ;;  %v630_v12 = vadd.f32 %v626_v7, %v2259_v17 }
 0x934   :  { %1989 = vtanh.f32 %v629_v9  ;;  %v1667_v15 = vmul.f32 -1.442695, %v629_v9  ;;  %v1668_v16 = vmul.f32 -1.442695, %v630_v12 }
 0x935   :  { %1991 = vtanh.f32 %v630_v12 }
 0x936   :  { %1993 = vpow2.f32 %v1667_v15 }
 0x937   :  { %1995 = vpow2.f32 %v1668_v16 }
 0x93e   :  { %v1990_v13 = vpop.eup %1989 }
 0x93f   :  { %v1992_v14 = vpop.eup %1991  ;;  %655 = vrot.lane.b32.xlu1 %v1990_v13, %s2136_s18 }
 0x940   :  { %657 = vrot.lane.b32.xlu0 %v1992_v14, %s2136_s18  ;;  %v1994_v18 = vpop.eup %1993 }
 0x941   :  { %v1996_v19 = vpop.eup %1995  ;;  %v637_v21 = vadd.f32 1.0, %v1994_v18 }
 0x942   :  { %v638_v22 = vadd.f32 1.0, %v1996_v19 }
 0x943   :  { %1997 = vrcp.f32 %v637_v21 }
 0x944   :  { %1999 = vrcp.f32 %v638_v22 }
 0x94d   :  { %v1998_v23 = vpop.eup %1997 }
 0x94e   :  { %v2000_v25 = vpop.eup %1999  ;;  %v651_v32 = vmul.f32 %v1998_v23, %v647_v30 }
 0x94f   :  { %v652_v33 = vmul.f32 %v2000_v25, %v648_v31 }
 0x9b1   :  { %v656_v24 = vpop.permute.xlu1 %655 }
 0x9b2   :  { %v658_v26 = vpop.permute.xlu0 %657  ;;  %v661_v28 = vmul.f32 %v1998_v23, %v656_v24 }
 0x9b3   :  { %v662_v29 = vmul.f32 %v2000_v25, %v658_v26 }
 0x9b4   :  { %665 = vrot.lane.b32.xlu1 %v661_v28, %s2137_s3 }
 0x9b5   :  { %667 = vrot.lane.b32.xlu0 %v662_v29, %s2137_s3 }
 0xa26   :  { %v666_v34 = vpop.permute.xlu1 %665 }
 0xa27   :  { %v668_v35 = vpop.permute.xlu0 %667  ;;  %v671_v36 = vadd.f32 %v666_v34, %v651_v32 }
 0xa28   :  { %v672_v37 = vadd.f32 %v668_v35, %v652_v33 }
 0xa29   :  { %2001 = vtanh.f32 %v671_v36  ;;  %v787_v7 = vrot.slane %v671_v36, 7 }
 0xa2a   :  { %2003 = vtanh.f32 %v672_v37  ;;  %v788_v8 = vrot.slane %v672_v37, 7 }
 0xa33   :  { %v2002_v38 = vpop.eup %2001 }
 0xa34   :  { %v2004_v39 = vpop.eup %2003  ;;  %677 = vrot.lane.b32.xlu1 %v2002_v38, %s2138_s19 }
 0xa35   :  { %679 = vrot.lane.b32.xlu0 %v2004_v39, %s2138_s19 }
 0xaa6   :  { %v678_v40 = vpop.permute.xlu1 %677 }
 0xaa7   :  { %v680_v41 = vpop.permute.xlu0 %679  ;;  %v683_v42 = vmul.f32 %v1998_v23, %v678_v40 }
 0xaa8   :  { %v684_v43 = vmul.f32 %v2000_v25, %v680_v41 }
 0xaa9   :  { %v687_v44 = vrot.slane %v683_v42, 3 }
 0xaaa   :  { %v688_v45 = vrot.slane %v684_v43, 2 }
 0xaac   :  { %v2326_v46 = vsel %vm270_vm2, %v688_v45, %v687_v44 }
 0xaad   :  { %690 = vrot.lane.b32.xlu1 %v2326_v46, %s2139_s20 }
 0xb1f   :  { %v691_v47 = vpop.permute.xlu1 %690 }
 0xb20   :  { %1785 = vmatmul.mubr.msk.f32.vlgmr.msra.gmra.mrb[2].mxu0 %vm139_vm3, %v691_v47 }
 0xb21   :  { %1889 = vmatpush3.bf16.msra.mxu0 %v2238_v11  ;;  %1798 = vmatprep.mubr.msk.f32.mxu0 %vm2134_vm1, %v2135_v10 }
 0xb22   :  { %1893 = vmatprep.subr.bf16.mxu0 %v2133_v6 }
 0xbf3   :  { %v760_v48 = vpop.f32.mrb[2].mxu0 }
 0xbf4   :  { %v765_v49 = vrot.slane %v760_v48, 4  ;;  %v766_v50 = vrot.slane %v760_v48, 5  ;;  %v1786_v52 = vpop.f32.mrb[3].mxu0 }
 0xbf6   :  { %v769_v53 = vadd.f32 %v765_v49, %v2261_v20  ;;  %v770_v54 = vadd.f32 %v766_v50, %v2259_v17 }
 0xbf8   :  { %2005 = vtanh.f32 %v769_v53  ;;  %v1670_v57 = vmul.f32 -1.442695, %v769_v53  ;;  %v1671_v58 = vmul.f32 -1.442695, %v770_v54 }
 0xbf9   :  { %2007 = vtanh.f32 %v770_v54 }
 0xbfa   :  { %2009 = vpow2.f32 %v1670_v57 }
 0xbfb   :  { %2011 = vpow2.f32 %v1671_v58 }
 0xc02   :  { %v2006_v55 = vpop.eup %2005 }
 0xc03   :  { %v2008_v56 = vpop.eup %2007  ;;  %795 = vrot.lane.b32.xlu0 %v2006_v55, %s2136_s18 }
 0xc04   :  { %797 = vrot.lane.b32.xlu1 %v2008_v56, %s2136_s18  ;;  %v2010_v59 = vpop.eup %2009 }
 0xc05   :  { %v2012_v60 = vpop.eup %2011  ;;  %v777_v61 = vadd.f32 1.0, %v2010_v59 }
 0xc06   :  { %v778_v62 = vadd.f32 1.0, %v2012_v60 }
 0xc07   :  { %2013 = vrcp.f32 %v777_v61 }
 0xc08   :  { %2015 = vrcp.f32 %v778_v62 }
 0xc11   :  { %v2014_v63 = vpop.eup %2013 }
 0xc12   :  { %v2016_v1 = vpop.eup %2015  ;;  %v791_v9 = vmul.f32 %v2014_v63, %v787_v7 }
 0xc13   :  { %v792_v12 = vmul.f32 %v2016_v1, %v788_v8 }
 0xc75   :  { %v796_v0 = vpop.permute.xlu0 %795 }
 0xc76   :  { %v798_v3 = vpop.permute.xlu1 %797  ;;  %v801_v4 = vmul.f32 %v2014_v63, %v796_v0 }
 0xc77   :  { %v802_v5 = vmul.f32 %v2016_v1, %v798_v3 }
 0xc78   :  { %805 = vrot.lane.b32.xlu0 %v801_v4, %s2137_s3 }
 0xc79   :  { %807 = vrot.lane.b32.xlu1 %v802_v5, %s2137_s3 }
 0xcea   :  { %v806_v13 = vpop.permute.xlu0 %805 }
 0xceb   :  { %v808_v14 = vpop.permute.xlu1 %807  ;;  %v811_v15 = vadd.f32 %v806_v13, %v791_v9 }
 0xcec   :  { %v812_v16 = vadd.f32 %v808_v14, %v792_v12 }
 0xced   :  { %2017 = vtanh.f32 %v811_v15  ;;  %v927_v50 = vrot.slane %v811_v15, 7 }
 0xcee   :  { %2019 = vtanh.f32 %v812_v16  ;;  %v928_v52 = vrot.slane %v812_v16, 7 }
 0xcf7   :  { %v2018_v18 = vpop.eup %2017 }
 0xcf8   :  { %v2020_v19 = vpop.eup %2019  ;;  %817 = vrot.lane.b32.xlu0 %v2018_v18, %s2138_s19 }
 0xcf9   :  { %819 = vrot.lane.b32.xlu1 %v2020_v19, %s2138_s19 }
 0xd6a   :  { %v818_v21 = vpop.permute.xlu0 %817 }
 0xd6b   :  { %v820_v22 = vpop.permute.xlu1 %819  ;;  %v823_v23 = vmul.f32 %v2014_v63, %v818_v21 }
 0xd6c   :  { %v824_v24 = vmul.f32 %v2016_v1, %v820_v22 }
 0xd6d   :  { %v827_v25 = vrot.slane %v823_v23, 4 }
 0xd6e   :  { %v828_v26 = vrot.slane %v824_v24, 3 }
 0xd70   :  { %v2344_v28 = vsel %vm270_vm2, %v828_v26, %v827_v25 }
 0xd71   :  { %830 = vrot.lane.b32.xlu0 %v2344_v28, %s2139_s20 }
 0xde3   :  { %v831_v29 = vpop.permute.xlu0 %830 }
 0xde4   :  { %1792 = vmatmul.mubr.msk.f32.vlgmr.msra.gmra.mrb[8].mxu1 %vm139_vm3, %v831_v29 }
 0xde5   :  { %1892 = vmatpush3.bf16.msra.mxu1 %v2238_v11  ;;  %1805 = vmatprep.mubr.msk.f32.mxu1 %vm2134_vm1, %v2135_v10 }
 0xde6   :  { %1917 = vmatprep.subr.bf16.mxu1 %v2133_v6 }
 0xeb7   :  { %v900_v30 = vpop.f32.mrb[8].mxu1 }
 0xeb8   :  { %v905_v31 = vrot.slane %v900_v30, 3  ;;  %v906_v32 = vrot.slane %v900_v30, 4  ;;  %v1793_v33 = vpop.f32.mrb[9].mxu1 }
 0xeba   :  { %v909_v34 = vadd.f32 %v905_v31, %v2261_v20  ;;  %v910_v35 = vadd.f32 %v906_v32, %v2259_v17 }
 0xebc   :  { %2021 = vtanh.f32 %v909_v34  ;;  %v1673_v11 = vmul.f32 -1.442695, %v909_v34  ;;  %v1674_v38 = vmul.f32 -1.442695, %v910_v35 }
 0xebd   :  { %2023 = vtanh.f32 %v910_v35 }
 0xebe   :  { %2025 = vpow2.f32 %v1673_v11 }
 0xebf   :  { %2027 = vpow2.f32 %v1674_v38 }
 0xec6   :  { %v2022_v36 = vpop.eup %2021 }
 0xec7   :  { %v2024_v37 = vpop.eup %2023  ;;  %935 = vrot.lane.b32.xlu1 %v2022_v36, %s2136_s18 }
 0xec8   :  { %937 = vrot.lane.b32.xlu0 %v2024_v37, %s2136_s18  ;;  %v2026_v39 = vpop.eup %2025 }
 0xec9   :  { %v2028_v40 = vpop.eup %2027  ;;  %v917_v41 = vadd.f32 1.0, %v2026_v39 }
 0xeca   :  { %v918_v42 = vadd.f32 1.0, %v2028_v40 }
 0xecb   :  { %2029 = vrcp.f32 %v917_v41 }
 0xecc   :  { %2031 = vrcp.f32 %v918_v42 }
 0xed5   :  { %v2030_v43 = vpop.eup %2029 }
 0xed6   :  { %v2032_v45 = vpop.eup %2031  ;;  %v931_v53 = vmul.f32 %v2030_v43, %v927_v50 }
 0xed7   :  { %v932_v54 = vmul.f32 %v2032_v45, %v928_v52 }
 0xf39   :  { %v936_v44 = vpop.permute.xlu1 %935 }
 0xf3a   :  { %v938_v47 = vpop.permute.xlu0 %937  ;;  %v941_v48 = vmul.f32 %v2030_v43, %v936_v44 }
 0xf3b   :  { %v942_v49 = vmul.f32 %v2032_v45, %v938_v47 }
 0xf3c   :  { %945 = vrot.lane.b32.xlu1 %v941_v48, %s2137_s3 }
 0xf3d   :  { %947 = vrot.lane.b32.xlu0 %v942_v49, %s2137_s3 }
 0xfae   :  { %v946_v55 = vpop.permute.xlu1 %945 }
 0xfaf   :  { %v948_v56 = vpop.permute.xlu0 %947  ;;  %v951_v57 = vadd.f32 %v946_v55, %v931_v53 }
 0xfb0   :  { %v952_v58 = vadd.f32 %v948_v56, %v932_v54 }
 0xfb1   :  { %2033 = vtanh.f32 %v951_v57  ;;  %v1067_v33 = vrot.slane %v951_v57, 7 }
 0xfb2   :  { %2035 = vtanh.f32 %v952_v58  ;;  %v1068_v34 = vrot.slane %v952_v58, 7 }
 0xfbb   :  { %v2034_v59 = vpop.eup %2033 }
 0xfbc   :  { %v2036_v60 = vpop.eup %2035  ;;  %957 = vrot.lane.b32.xlu1 %v2034_v59, %s2138_s19 }
 0xfbd   :  { %959 = vrot.lane.b32.xlu0 %v2036_v60, %s2138_s19 }
0x102e   :  { %v958_v61 = vpop.permute.xlu1 %957 }
0x102f   :  { %v960_v62 = vpop.permute.xlu0 %959  ;;  %v963_v63 = vmul.f32 %v2030_v43, %v958_v61 }
0x1030   :  { %v964_v0 = vmul.f32 %v2032_v45, %v960_v62 }
0x1031   :  { %v967_v1 = vrot.slane %v963_v63, 5 }
0x1032   :  { %v968_v3 = vrot.slane %v964_v0, 4 }
0x1034   :  { %v2362_v4 = vsel %vm270_vm2, %v968_v3, %v967_v1 }
0x1035   :  { %970 = vrot.lane.b32.xlu1 %v2362_v4, %s2139_s20 }
0x10a7   :  { %v971_v5 = vpop.permute.xlu1 %970 }
0x10a8   :  { %1799 = vmatmul.mubr.msk.f32.vlgmr.msra.gmra.mrb[4].mxu0 %vm139_vm3, %v971_v5 }
0x10a9   :  { %1840 = vmatprep.mubr.msk.f32.mxu0 %vm2134_vm1, %v2135_v10 }
0x117b   :  { %v1040_v7 = vpop.f32.mrb[4].mxu0 }
0x117c   :  { %v1045_v8 = vrot.slane %v1040_v7, 2  ;;  %v1046_v9 = vrot.slane %v1040_v7, 3  ;;  %v1800_v12 = vpop.f32.mrb[5].mxu0 }
0x117e   :  { %v1049_v13 = vadd.f32 %v1045_v8, %v2261_v20  ;;  %v1050_v14 = vadd.f32 %v1046_v9, %v2259_v17 }
0x1180   :  { %2037 = vtanh.f32 %v1049_v13  ;;  %v1676_v18 = vmul.f32 -1.442695, %v1049_v13  ;;  %v1677_v19 = vmul.f32 -1.442695, %v1050_v14 }
0x1181   :  { %2039 = vtanh.f32 %v1050_v14 }
0x1182   :  { %2041 = vpow2.f32 %v1676_v18 }
0x1183   :  { %2043 = vpow2.f32 %v1677_v19 }
0x118a   :  { %v2038_v15 = vpop.eup %2037 }
0x118b   :  { %v2040_v16 = vpop.eup %2039  ;;  %1075 = vrot.lane.b32.xlu0 %v2038_v15, %s2136_s18 }
0x118c   :  { %1077 = vrot.lane.b32.xlu1 %v2040_v16, %s2136_s18  ;;  %v2042_v21 = vpop.eup %2041 }
0x118d   :  { %v2044_v22 = vpop.eup %2043  ;;  %v1057_v23 = vadd.f32 1.0, %v2042_v21 }
0x118e   :  { %v1058_v24 = vadd.f32 1.0, %v2044_v22  ;;  %v1282_v22 = vld [vmem:[%s2552_s4] sm:$0xff] }
0x118f   :  { %2045 = vrcp.f32 %v1057_v23  ;;  %v1283_v23 = vld [vmem:[%s2552_s4 + $0x8] sm:$0xff] }
0x1190   :  { %2047 = vrcp.f32 %v1058_v24  ;;  %v1284_v24 = vld [vmem:[%s2552_s4 + $0x10] sm:$0xff] }
0x1199   :  { %v2046_v25 = vpop.eup %2045 }
0x119a   :  { %v2048_v29 = vpop.eup %2047  ;;  %v1071_v35 = vmul.f32 %v2046_v25, %v1067_v33 }
0x119b   :  { %v1072_v36 = vmul.f32 %v2048_v29, %v1068_v34  ;;  %v1288_v34 = vld [vmem:[%s2552_s4 + $0x30] sm:$0xff] }
0x11fd   :  { %v1076_v26 = vpop.permute.xlu0 %1075 }
0x11fe   :  { %v1078_v30 = vpop.permute.xlu1 %1077  ;;  %v1081_v31 = vmul.f32 %v2046_v25, %v1076_v26  ;;  %v1894_v26 = vpack.c.bf16 %v1283_v23, %v1282_v22  ;;  %v1580_v23 = vld [vmem:[%s2558_s10 + $0x8] sm:$0xff] }
0x11ff   :  { %v1082_v32 = vmul.f32 %v2048_v29, %v1078_v30 }
0x1200   :  { %1085 = vrot.lane.b32.xlu0 %v1081_v31, %s2137_s3  ;;  %1895 = vmatpush3.bf16.msra.mxu0 %v1894_v26  ;;  %v1286_v31 = vld [vmem:[%s2552_s4 + $0x20] sm:$0xff] }
0x1201   :  { %1087 = vrot.lane.b32.xlu1 %v1082_v32, %s2137_s3  ;;  %1896 = vmatprep.subr.bf16.mxu0 %v2133_v6  ;;  %v1287_v32 = vld [vmem:[%s2552_s4 + $0x28] sm:$0xff] }
0x1202   :  { %v1900_v33 = vpack.c.bf16 %v1287_v32, %v1286_v31  ;;  %v2143_v32 = vmov 1966171168  }
0x1272   :  { %v1086_v37 = vpop.permute.xlu0 %1085 }
0x1273   :  { %v1088_v11 = vpop.permute.xlu1 %1087  ;;  %v1091_v38 = vadd.f32 %v1086_v37, %v1071_v35  ;;  %v1289_v35 = vld [vmem:[%s2552_s4 + $0x38] sm:$0xff] }
0x1274   :  { %v1092_v39 = vadd.f32 %v1088_v11, %v1072_v36  ;;  %v1291_v36 = vld [vmem:[%s2552_s4 + $0x48] sm:$0xff]  ;;  %v1293_v37 = vld [vmem:[%s2552_s4 + $0x58] sm:$0xff] }
0x1275   :  { %2049 = vtanh.f32 %v1091_v38  ;;  %v1207_v9 = vrot.slane %v1091_v38, 7  ;;  %v1294_v38 = vld [vmem:[%s2552_s4 + $0x60] sm:$0xff] }
0x1276   :  { %2051 = vtanh.f32 %v1092_v39  ;;  %v1208_v12 = vrot.slane %v1092_v39, 7  ;;  %v1295_v39 = vld [vmem:[%s2552_s4 + $0x68] sm:$0xff] }
0x127f   :  { %v2050_v40 = vpop.eup %2049 }
0x1280   :  { %v2052_v41 = vpop.eup %2051  ;;  %1097 = vrot.lane.b32.xlu0 %v2050_v40, %s2138_s19  ;;  %v1912_v40 = vpack.c.bf16 %v1295_v39, %v1294_v38 }
0x1281   :  { %1099 = vrot.lane.b32.xlu1 %v2052_v41, %s2138_s19  ;;  %v1296_v41 = vld [vmem:[%s2552_s4 + $0x70] sm:$0xff] }
0x12f2   :  { %v1098_v42 = vpop.permute.xlu0 %1097 }
0x12f3   :  { %v1100_v43 = vpop.permute.xlu1 %1099  ;;  %v1103_v44 = vmul.f32 %v2046_v25, %v1098_v42  ;;  %v1297_v42 = vld [vmem:[%s2552_s4 + $0x78] sm:$0xff] }
0x12f4   :  { %v1104_v45 = vmul.f32 %v2048_v29, %v1100_v43  ;;  %v1285_v29 = vld [vmem:[%s2552_s4 + $0x18] sm:$0xff]  ;;  %v1915_v43 = vpack.c.bf16 %v1297_v42, %v1296_v41 }
0x12f5   :  { %v1107_v47 = vrot.slane %v1103_v44, 6  ;;  %v1897_v30 = vpack.c.bf16 %v1285_v29, %v1284_v24  ;;  %v1376_v44 = vld [vmem:[%s2554_s6] sm:$0xff] }
0x12f6   :  { %v1108_v48 = vrot.slane %v1104_v45, 5  ;;  %v1377_v45 = vld [vmem:[%s2554_s6 + $0x8] sm:$0xff] }
0x12f7   :  { %1898 = vmatpush3.bf16.msra.mxu0 %v1897_v30 }
0x12f8   :  { %v2378_v49 = vsel %vm270_vm2, %v1108_v48, %v1107_v47  ;;  %1899 = vmatprep.subr.bf16.mxu0 %v2133_v6  ;;  %v1918_v47 = vpack.c.bf16 %v1377_v45, %v1376_v44 }
0x12f9   :  { %1110 = vrot.lane.b32.xlu0 %v2378_v49, %s2139_s20 }
0x12fb   :  { %1901 = vmatpush3.bf16.msra.mxu0 %v1900_v33  ;;  %v1545_v33 = vunpack.c.l.s4 %v2143_v32 }
0x12fc   :  { %1902 = vmatprep.subr.bf16.mxu0 %v2133_v6 }
0x136b   :  { %v1111_v50 = vpop.permute.xlu0 %1110 }
0x136c   :  { %1806 = vmatmul.mubr.msk.f32.vlgmr.msra.gmra.mrb[10].mxu1 %vm139_vm3, %v1111_v50 }
0x136d   :  { %1851 = vmatprep.mubr.msk.f32.mxu1 %vm2134_vm1, %v2135_v10  ;;  %1919 = vmatpush3.bf16.msra.mxu1 %v1918_v47 }
0x136e   :  { %1920 = vmatprep.subr.bf16.mxu1 %v2133_v6 }
0x143f   :  { %v1180_v52 = vpop.f32.mrb[10].mxu1 }
0x1440   :  { %v1185_v53 = vrot.slane %v1180_v52, 1  ;;  %v1186_v54 = vrot.slane %v1180_v52, 2  ;;  %v1807_v55 = vpop.f32.mrb[11].mxu1 }
0x1442   :  { %v1189_v56 = vadd.f32 %v1185_v53, %v2261_v20  ;;  %v1190_v57 = vadd.f32 %v1186_v54, %v2259_v17 }
0x1444   :  { %2053 = vtanh.f32 %v1189_v56  ;;  %v1679_v60 = vmul.f32 -1.442695, %v1189_v56  ;;  %v1680_v61 = vmul.f32 -1.442695, %v1190_v57 }
0x1445   :  { %2055 = vtanh.f32 %v1190_v57 }
0x1446   :  { %2057 = vpow2.f32 %v1679_v60 }
0x1447   :  { %2059 = vpow2.f32 %v1680_v61 }
0x144e   :  { %v2054_v58 = vpop.eup %2053 }
0x144f   :  { %v2056_v59 = vpop.eup %2055  ;;  %1215 = vrot.lane.b32.xlu1 %v2054_v58, %s2136_s18 }
0x1450   :  { %1217 = vrot.lane.b32.xlu0 %v2056_v59, %s2136_s18  ;;  %v2058_v62 = vpop.eup %2057 }
0x1451   :  { %v2060_v63 = vpop.eup %2059  ;;  %v1197_v0 = vadd.f32 1.0, %v2058_v62 }
0x1452   :  { %v1198_v1 = vadd.f32 1.0, %v2060_v63 }
0x1453   :  { %2061 = vrcp.f32 %v1197_v0 }
0x1454   :  { %2063 = vrcp.f32 %v1198_v1 }
0x145d   :  { %v2389_v20 = vpop.eup %2061 }
0x145e   :  { %v2391_v3 = vpop.eup %2063  ;;  %v1211_v13 = vmul.f32 %v2389_v20, %v1207_v9 }
0x145f   :  { %v1212_v14 = vmul.f32 %v2391_v3, %v1208_v12 }
0x14c1   :  { %v1216_v17 = vpop.permute.xlu1 %1215 }
0x14c2   :  { %v1218_v5 = vpop.permute.xlu0 %1217  ;;  %v1221_v7 = vmul.f32 %v2389_v20, %v1216_v17 }
0x14c3   :  { %v1222_v8 = vmul.f32 %v2391_v3, %v1218_v5 }
0x14c4   :  { %1225 = vrot.lane.b32.xlu1 %v1221_v7, %s2137_s3  ;;  %v1681_v7 = vld [vmem:[%s2553_s5] ss:$0 sm:$0xff] }
0x14c5   :  { %1227 = vrot.lane.b32.xlu0 %v1222_v8, %s2137_s3 }
0x1536   :  { %v1226_v15 = vpop.permute.xlu1 %1225 }
0x1537   :  { %v1228_v16 = vpop.permute.xlu0 %1227  ;;  %v1231_v18 = vadd.f32 %v1226_v15, %v1211_v13 }
0x1538   :  { %v1232_v19 = vadd.f32 %v1228_v16, %v1212_v14  ;;  %v1461_v14 = vld [vmem:[%s2556_s8] sm:$0xff] }
0x1539   :  { %2065 = vtanh.f32 %v1231_v18  ;;  %v1682_v16 = vld [vmem:[%s2555_s7] ss:$0 sm:$0xff] }
0x153a   :  { %2067 = vtanh.f32 %v1232_v19 }
0x1543   :  { %v2066_v21 = vpop.eup %2065 }
0x1544   :  { %v2068_v25 = vpop.eup %2067  ;;  %1237 = vrot.lane.b32.xlu1 %v2066_v21, %s2138_s19 }
0x1545   :  { %1239 = vrot.lane.b32.xlu0 %v2068_v25, %s2138_s19 }
0x1548   :  { %1246 = vrot.lane.b32.xlu1 %v2290_v27, %s2136_s18  ;;  %v1903_v27 = vpack.c.bf16 %v1289_v35, %v1288_v34  ;;  %v1547_v34 = vlaneseq  ;;  %v1546_v35 = vunpack.c.0.s8 %v1545_v33 }
0x1549   :  { %1249 = vrot.lane.b32.xlu0 %v2308_v2, %s2140_s15  ;;  %v1290_v2 = vld [vmem:[%s2552_s4 + $0x40] sm:$0xff] }
0x154a   :  { %1904 = vmatpush3.bf16.msra.mxu0 %v1903_v27  ;;  %v1548_v27 = vshrl.u32 %v1547_v34, 7 }
0x154b   :  { %1905 = vmatprep.subr.bf16.mxu0 %v2133_v6 }
0x154c   :  { %1253 = vrot.lane.b32.xlu1 %v2344_v28, %s2137_s3  ;;  %v1906_v28 = vpack.c.bf16 %v1291_v36, %v1290_v2  ;;  %v1684_v36 = vld [vmem:[%s2557_s9] ss:$0 sm:$0xff]  ;;  %v1568_v41 = vsub.s32 0, %v1548_v27  ;;  %s2144_s9 = smov [#allocation4]  }
0x154d   :  { %1256 = vrot.lane.b32.xlu0 %v2362_v4, %s2138_s19  ;;  %v1292_v4 = vld [vmem:[%s2552_s4 + $0x50] sm:$0xff]  ;;  %s2142_s4 = smov 64  }
0x154e   :  { %1907 = vmatpush3.bf16.msra.mxu0 %v1906_v28  ;;  %v1909_v11 = vpack.c.bf16 %v1293_v37, %v1292_v4  ;;  %v1549_v28 = vsub.s32 %v1546_v35, %v1548_v27 }
0x154f   :  { %1908 = vmatprep.subr.bf16.mxu0 %v2133_v6 }
0x1550   :  { %1259 = vrot.lane.b32.xlu1 %v2378_v49, %s2141_s22 }
0x1552   :  { %1910 = vmatpush3.bf16.msra.mxu0 %v1909_v11 }
0x1553   :  { %1911 = vmatprep.subr.bf16.mxu0 %v2133_v6 }
0x1556   :  { %1913 = vmatpush3.bf16.msra.mxu0 %v1912_v40 }
0x1557   :  { %1914 = vmatprep.subr.bf16.mxu0 %v2133_v6 }
0x155a   :  { %1916 = vmatpush3.bf16.msra.mxu0 %v1915_v43 }
0x15b6   :  { %v1238_v48 = vpop.permute.xlu1 %1237 }
0x15b7   :  { %v1240_v49 = vpop.permute.xlu0 %1239  ;;  %v1243_v50 = vmul.f32 %v2389_v20, %v1238_v48 }
0x15b8   :  { %v1244_v52 = vmul.f32 %v2391_v3, %v1240_v49 }
0x15b9   :  { %v1264_v53 = vrot.slane %v1243_v50, 7 }
0x15ba   :  { %v1265_v54 = vrot.slane %v1244_v52, 6  ;;  %v1247_v56 = vpop.permute.xlu1 %1246 }
0x15bb   :  { %v1250_v57 = vpop.permute.xlu0 %1249  ;;  %v1270_v58 = vsel %vm139_vm3, %v2273_v51, %v1247_v56  ;;  %v1378_v51 = vld [vmem:[%s2554_s6 + $0x10] sm:$0xff] }
0x15bc   :  { %v1266_v55 = vsel %vm270_vm2, %v1265_v54, %v1264_v53  ;;  %v1271_v59 = vsel %vm55_vm0, %v1270_v58, %v1250_v57 }
0x15bd   :  { %1267 = vrot.lane.b32.xlu0 %v1266_v55, %s2142_s4  ;;  %v1273_v61 = vsel %vm1272_vm4, %v1271_v59, %v2326_v46  ;;  %v1379_v46 = vld [vmem:[%s2554_s6 + $0x18] sm:$0xff] }
0x15be   :  { %v1254_v60 = vpop.permute.xlu1 %1253  ;;  %v1921_v5 = vpack.c.bf16 %v1379_v46, %v1378_v51 }
0x15bf   :  { %v1257_v62 = vpop.permute.xlu0 %1256  ;;  %v1275_v63 = vsel %vm1274_vm5, %v1273_v61, %v1254_v60 }
0x15c0   :  { %v1277_v1 = vsel %vm1276_vm6, %v1275_v63, %v1257_v62  ;;  %1922 = vmatpush3.bf16.msra.mxu1 %v1921_v5 }
0x15c1   :  { %1923 = vmatprep.subr.bf16.mxu1 %v2133_v6  ;;  %v1462_v6 = vld [vmem:[%s2556_s8 + $0x8] sm:$0xff] }
0x15c2   :  { %v1260_v0 = vpop.permute.xlu1 %1259  ;;  %v1924_v15 = vpack.c.bf16 %v1462_v6, %v1461_v14 }
0x15c3   :  { %v1279_v20 = vsel %vm1278_vm7, %v1277_v1, %v1260_v0 }
0x162f   :  { %v1268_v17 = vpop.permute.xlu0 %1267 }
0x1630   :  { %v1281_v3 = vsel %vm1280_vm8, %v1279_v20, %v1268_v17 }
0x1631   :  { %1841 = vmatmul.mubr.f32.vlgmr.msra.gmra.mrb[6].mxu0 %v1281_v3 }
0x1704   :  { %v1371_v8 = vpop.f32.mrb[6].mxu0 }
0x1705   :  { %v1372_v9 = vadd.f32 %v1681_v7, %v1371_v8  ;;  %v1842_v12 = vpop.f32.mrb[7].mxu0 }
0x1707   :  { %v1375_v13 = vmax.f32 %v1372_v9, 0.0 }
0x1709   :  { %1852 = vmatmul.mubr.msk.f32.vlgmr.msra.gmra.mrb[12].mxu1 %vm55_vm0, %v1375_v13 }
0x170a   :  { %1858 = vmatprep.mubr.msk.f32.mxu1 %vm2134_vm1, %v2135_v10  ;;  %1925 = vmatpush3.bf16.msra.mxu1 %v1924_v15  ;;  %v1579_v10 = vld [vmem:[%s2558_s10] sm:$0xff]  ;;  %s1640_s10 = sshll.u32 %s2144_s9, 4  ;;  %s1641_s10 = int_to_ptr.vmem [resolvable:$true] %s1640_s10 }
0x170b   :  { %2069 = vlog2.f32 %v1579_v10  ;;  %s2085_s29 = scalar_lea.vmem %s1641_s10, 256  ;;  %p2090_p1 = scmp.lt.s32.totalorder %s1641_s10, %s1641_s10 }
0x170c   :  { %2071 = vlog2.f32 %v1580_v23  ;;  %p2086_p0 = scmp.ne.s32.totalorder %s1641_s10, %s2085_s29  ;;  %p2091_p2 = scmp.lt.s32.totalorder %s2085_s29, %s2085_s29 }
0x170e   :  { %p2092_p3 = por %p2091_p2, %p2090_p1 }
0x1710   :  { %p2093_p4 = pnand %p2092_p3, %p2086_p0 }
0x1715   :  { %v2070_v24 = vpop.eup %2069 }
0x1716   :  { %v2072_v25 = vpop.eup %2071  ;;  %v1582_v26 = vmul.f32 0.6931472, %v2070_v24 }
0x1717   :  { %v1584_v29 = vmul.f32 0.6931472, %v2072_v25 }
0x1718   :  { %v1585_v30 = vsub.f32 0.0, %v1582_v26 }
0x1719   :  { %v1586_v31 = vsub.f32 0.0, %v1584_v29 }
0x171a   :  { %2073 = vlog2.f32 %v1585_v30 }
0x171b   :  { %2075 = vlog2.f32 %v1586_v31 }
0x1724   :  { %v2074_v2 = vpop.eup %2073 }
0x1725   :  { %v2076_v4 = vpop.eup %2075  ;;  %v1588_v39 = vmul.f32 0.6931472, %v2074_v2 }
0x1726   :  { %v1590_v42 = vmul.f32 0.6931472, %v2076_v4 }
0x1727   :  { %v1591_v45 = vsub.f32 0.0, %v1588_v39 }
0x1728   :  { %v1592_v49 = vsub.f32 0.0, %v1590_v42 }
0x17dc   :  { %v1456_v18 = vpop.f32.mrb[12].mxu1 }
0x17dd   :  { %v1457_v19 = vadd.f32 %v1682_v16, %v1456_v18  ;;  %v1853_v21 = vpop.f32.mrb[13].mxu1 }
0x17df   :  { %v1460_v22 = vmax.f32 %v1457_v19, 0.0 }
0x17e1   :  { %1859 = vmatmul.mubr.msk.f32.vlgmr.msra.gmra.mrb[14].mxu1 %vm139_vm3, %v1460_v22 }
0x18b4   :  { %v1539_v37 = vpop.f32.mrb[14].mxu1 }
0x18b5   :  { %v1540_v11 = vadd.f32 %v1684_v36, %v1539_v37  ;;  %v1860_v38 = vpop.f32.mrb[15].mxu1 }
0x18b7   :  { %v1550_v40 = vrot.slane %v1540_v11, %v1549_v28 }
0x18b9   :  { %v1551_v43 = vcombine.high %v1550_v40, %v1550_v40  ;;  %v1558_v44 = vrot.slane %v1550_v40, %v1549_v28 }
0x18bb   :  { %v1565_v47 = vrot.slane %v1551_v43, %v1549_v28  ;;  %v1569_v48 = vrot.slane %v1558_v44, %v1568_v41 }
0x18bd   :  { %v1593_v50 = vadd.f32 %v1591_v45, %v1569_v48  ;;  %1577 = vst.msk [vmem:[#allocation4] sm:$0xff] %vm1576_vm9, %v1569_v48  ;;  %v1573_v52 = vrot.slane %v1565_v47, %v1568_v41 }
0x18bf   :  { %v1595_v53 = vmul.f32 2.0, %v1593_v50  ;;  %v1594_v54 = vadd.f32 %v1592_v49, %v1573_v52  ;;  %1578 = vst.msk [vmem:[#allocation4 + $0x8] sm:$0xff] %vm1576_vm9, %v1573_v52 }
0x18c1   :  { %v1597_v55 = vsel %vm1576_vm9, %v1595_v53, -inf  ;;  %v1596_v56 = vmul.f32 2.0, %v1594_v54 }
0x18c2   :  { %1598 = vmax.xlane.f32.xlu1 %v1597_v55 }
0x18c3   :  { %v1600_v57 = vsel %vm1576_vm9, %v1596_v56, -inf }
0x18c4   :  { %1601 = vmax.xlane.f32.xlu0 %v1600_v57 }
0x194f   :  { %v1599_v58 = vpop.xlane.xlu1 %1598 }
0x1950   :  { %v1603_v59 = vsub.f32 %v1595_v53, %v1599_v58 }
0x1951   :  { %v1602_v60 = vpop.xlane.xlu0 %1601 }
0x1952   :  { %v1605_v61 = vmul.f32 1.442695, %v1603_v59  ;;  %v1604_v62 = vsub.f32 %v1596_v56, %v1602_v60 }
0x1954   :  { %2077 = vpow2.f32 %v1605_v61  ;;  %v1607_v63 = vmul.f32 1.442695, %v1604_v62 }
0x1956   :  { %2079 = vpow2.f32 %v1607_v63 }
0x195e   :  { %v2078_v0 = vpop.eup %2077 }
0x195f   :  { %v1609_v1 = vsel %vm1576_vm9, %v2078_v0, 0.0 }
0x1960   :  { %v2080_v20 = vpop.eup %2079  ;;  %1610 = vadd.xlane.f32.xlu0 %v1609_v1 }
0x1961   :  { %v1612_v17 = vsel %vm1576_vm9, %v2080_v20, 0.0 }
0x1962   :  { %1613 = vadd.xlane.f32.xlu1 %v1612_v17 }
0x1963   :  { %2096 = shalt.err (!%p2093_p4)
}
0x1964   :  { %s2097_s14 = scalar_lea.hbm %s2560_s12, 256 }
0x1965   :  { %p2098_p5 = scmp.ne.s32.totalorder %s2560_s12, %s2097_s14  ;;  %p2101_p6 = scmp.lt.u32.totalorder %s2097_s14, %s2560_s12 }
0x1967   :  { %p2103_p7 = pnand %p2101_p6, %p2098_p5 }
0x1969   :  { %2106 = shalt.err (!%p2103_p7)
}
0x196a   :  { %s2145_s4 = smov 128   ;;  %s2146_s0 = smov 8  }
0x196b   :  { %1646 = dma.vmem_to_hbm [thread:$0]  %s1641_s10, 256, %s2560_s12, [#allocation5], %s2145_s4, %s2145_s4, %s2146_s0  }
0x196c   :  { %s2147_s20 = smov [#allocation2]  }
0x196d   :  { %s1628_s21 = sshll.u32 %s2147_s20, 4  ;;  %s1629_s21 = int_to_ptr.vmem [resolvable:$true] %s1628_s21 }
0x196e   :  { %s2107_s22 = scalar_lea.vmem %s1629_s21, 256  ;;  %p2112_p9 = scmp.lt.s32.totalorder %s1629_s21, %s1629_s21 }
0x196f   :  { %p2108_p8 = scmp.ne.s32.totalorder %s1629_s21, %s2107_s22  ;;  %p2113_p10 = scmp.lt.s32.totalorder %s2107_s22, %s2107_s22 }
0x1971   :  { %p2114_p11 = por %p2113_p10, %p2112_p9 }
0x1973   :  { %p2115_p12 = pnand %p2114_p11, %p2108_p8 }
0x19ed   :  { %v1611_v3 = vpop.xlane.xlu0 %1610 }
0x19ee   :  { %2081 = vrcp.f32 %v1611_v3 }
0x19ef   :  { %v1614_v51 = vpop.xlane.xlu1 %1613 }
0x19f0   :  { %2083 = vrcp.f32 %v1614_v51 }
0x19f8   :  { %v2082_v46 = vpop.eup %2081 }
0x19f9   :  { %v1619_v5 = vmul.f32 %v2082_v46, %v2078_v0 }
0x19fa   :  { %v2084_v7 = vpop.eup %2083 }
0x19fb   :  { %v1620_v8 = vmul.f32 %v2084_v7, %v2080_v20  ;;  %1621 = vst.msk [vmem:[#allocation2] sm:$0xff] %vm1576_vm9, %v1619_v5 }
0x19fd   :  { %1622 = vst.msk [vmem:[#allocation2 + $0x8] sm:$0xff] %vm1576_vm9, %v1620_v8 }
0x19fe   :  { %2118 = shalt.err (!%p2115_p12)
}
0x19ff   :  { %s2119_s19 = scalar_lea.hbm %s2559_s11, 256 }
0x1a00   :  { %p2120_p13 = scmp.ne.s32.totalorder %s2559_s11, %s2119_s19  ;;  %p2123_p0 = scmp.lt.u32.totalorder %s2119_s19, %s2559_s11 }
0x1a02   :  { %p2125_p1 = pnand %p2123_p0, %p2120_p13 }
0x1a04   :  { %2128 = shalt.err (!%p2125_p1)
}
0x1a05   :  { %1634 = dma.vmem_to_hbm [thread:$0]  %s1629_s21, 256, %s2559_s11, [#allocation3], %s2145_s4, %s2145_s4, %s2146_s0  }
0x1a06   :  { %2129 = dma.done.wait [#allocation3], 256  }
0x1a07   :  { %2130 = vsyncadd [#allocation3], 4294967040 }
0x1a08   :  { %2131 = dma.done.wait [#allocation5], 256  }
0x1a09   :  { %2132 = vsyncadd [#allocation5], 4294967040 }
0x1a0a   :  { %1653 = vsyncpa [#allocation3], 1 }
0x1a0b   :  { %1654 = vsyncpa [#allocation5], 1 }

</bundles_post_ra>
